<compile_context>
chip_gen: v6e
topology: v6e:2x2x1
jax: 0.10.0
libtpu: 0.0.40
codegen_flags: <defaults>
</compile_context>

<pallas_src>
import functools

import jax
import jax.numpy as jnp
import numpy as np
from jax.experimental import pallas as pl
from jax.experimental.pallas import tpu as pltpu


def _full_spec(shape):
    nd = len(shape)
    return pl.BlockSpec(shape, lambda b, _nd=nd: (0,) * _nd)


def unet_kernel(feat_ref,
                w1_ref, b1_ref,
                ew1_ref, eb1_ref, ew2_ref, ecw_ref,
                tw1_ref, tb1_ref, tw2_ref, tcw_ref,
                dw1x_ref, dw1s_ref, db1_ref, dw2_ref, dcw_ref,
                w2_ref, b2_ref,
                out_ref,
                pad_ref,
                *, n_enc, n_tf, lorder, T, hidden):
    # Causal-pad region of the conv scratch: zeroed once, never overwritten afterwards.
    pad_ref[0:lorder - 1, :] = jnp.zeros((lorder - 1, hidden), jnp.float32)

    def causal_conv(p, cw):
        # p: (T, H) f32, cw: (lorder, H) f32, cw[k, d] == torch conv.weight[d, 0, k, 0]
        pad_ref[lorder - 1:lorder - 1 + T, :] = p
        acc = p * cw[lorder - 1:lorder, :]          # tap with zero time shift
        for k in range(lorder - 1):                 # remaining causal taps
            acc = acc + pad_ref[k:k + T, :] * cw[k:k + 1, :]
        return acc

    def fsmn_block(x, bw1, bb1, bw2, bcw):
        # Linear + ReLU, Linear (no bias), causal depthwise conv with additive skip.
        a = jnp.maximum(
            jnp.dot(x, bw1, preferred_element_type=jnp.float32) + bb1, 0.0)
        p = jnp.dot(a, bw2, preferred_element_type=jnp.float32)
        return p + causal_conv(p, bcw)

    x = feat_ref[...]                               # (T, indim) f32

    # linear1 + RectifiedLinear
    x = jnp.maximum(
        jnp.dot(x, w1_ref[...], preferred_element_type=jnp.float32) + b1_ref[...],
        0.0)

    # ---------------- encoder ----------------
    enc_outs = []
    for i in range(n_enc):
        x = fsmn_block(x, ew1_ref[i], eb1_ref[i], ew2_ref[i], ecw_ref[i])
        enc_outs.append(x)

    # ---------------- tf (bottleneck) ----------------
    for i in range(n_tf):
        x = fsmn_block(x, tw1_ref[i], tb1_ref[i], tw2_ref[i], tcw_ref[i])

    # ---------------- decoder (skip-concat as split matmuls) ----------------
    for i in range(n_enc):
        skip = enc_outs[n_enc - 1 - i]
        a = jnp.maximum(
            jnp.dot(x, dw1x_ref[i], preferred_element_type=jnp.float32)
            + jnp.dot(skip, dw1s_ref[i], preferred_element_type=jnp.float32)
            + db1_ref[i], 0.0)
        p = jnp.dot(a, dw2_ref[i], preferred_element_type=jnp.float32)
        x = p + causal_conv(p, dcw_ref[i])

    # linear2 + Sigmoid (crm=False, linearout=False path)
    y = jnp.dot(x, w2_ref[...], preferred_element_type=jnp.float32) + b2_ref[...]
    out_ref[...] = jax.nn.sigmoid(y).astype(out_ref.dtype)


def unet_forward(feat, params, *, lorder):
    (w1, b1, ew1, eb1, ew2, ecw, tw1, tb1, tw2, tcw,
     dw1x, dw1s, db1, dw2, dcw, w2, b2) = params
    B, T, indim = feat.shape
    hidden = w1.shape[1]
    outdim = w2.shape[1]
    n_enc = ew1.shape[0]
    n_tf = tw1.shape[0]

    kernel = functools.partial(
        unet_kernel, n_enc=n_enc, n_tf=n_tf, lorder=lorder, T=T, hidden=hidden)

    weights = (w1, b1, ew1, eb1, ew2, ecw, tw1, tb1, tw2, tcw,
               dw1x, dw1s, db1, dw2, dcw, w2, b2)
    in_specs = ([pl.BlockSpec((None, T, indim), lambda b: (b, 0, 0))]
                + [_full_spec(w.shape) for w in weights])
    out_spec = pl.BlockSpec((None, T, outdim), lambda b: (b, 0, 0))

    return pl.pallas_call(
        kernel,
        out_shape=jax.ShapeDtypeStruct((B, T, outdim), jnp.float32),
        grid=(B,),
        in_specs=in_specs,
        out_specs=out_spec,
        scratch_shapes=[pltpu.VMEM((lorder - 1 + T, hidden), jnp.float32)],
        compiler_params=pltpu.CompilerParams(
            dimension_semantics=("parallel",),
            vmem_limit_bytes=32 * 1024 * 1024),
    )(feat, *weights)


def init_params(key, indim, hidden, outdim, layers, lorder, n_scales=4):
    """Weights stored (in, out) (transposed vs torch nn.Linear); matmul weights bf16."""
    n_enc = n_scales - 1
    n_tf = layers - 2 * n_enc
    assert n_tf >= 1
    ks = jax.random.split(key, 17)
    s = 0.1
    bf = jnp.bfloat16

    def rn(k, shape, dtype=jnp.float32):
        return (s * jax.random.normal(k, shape, jnp.float32)).astype(dtype)

    w1 = rn(ks[0], (indim, hidden), bf)
    b1 = rn(ks[1], (1, hidden))
    ew1 = rn(ks[2], (n_enc, hidden, hidden), bf)     # encoder Linear (+bias)
    eb1 = rn(ks[3], (n_enc, 1, hidden))
    ew2 = rn(ks[4], (n_enc, hidden, hidden), bf)     # encoder Linear (no bias)
    ecw = rn(ks[5], (n_enc, lorder, hidden))         # depthwise causal conv taps
    tw1 = rn(ks[6], (n_tf, hidden, hidden), bf)
    tb1 = rn(ks[7], (n_tf, 1, hidden))
    tw2 = rn(ks[8], (n_tf, hidden, hidden), bf)
    tcw = rn(ks[9], (n_tf, lorder, hidden))
    dw1x = rn(ks[10], (n_enc, hidden, hidden), bf)   # decoder Linear, half acting on x
    dw1s = rn(ks[11], (n_enc, hidden, hidden), bf)   # decoder Linear, half acting on skip
    db1 = rn(ks[12], (n_enc, 1, hidden))
    dw2 = rn(ks[13], (n_enc, hidden, hidden), bf)
    dcw = rn(ks[14], (n_enc, lorder, hidden))
    w2 = rn(ks[15], (hidden, outdim), bf)
    b2 = rn(ks[16], (1, outdim))
    return (w1, b1, ew1, eb1, ew2, ecw, tw1, tb1, tw2, tcw,
            dw1x, dw1s, db1, dw2, dcw, w2, b2)


def unet_ref(feat, params, *, lorder):
    """Pure-JAX reference mirroring the PyTorch forward (concat-based decoder)."""
    (w1, b1, ew1, eb1, ew2, ecw, tw1, tb1, tw2, tcw,
     dw1x, dw1s, db1, dw2, dcw, w2, b2) = params
    B, T, _ = feat.shape
    f32 = lambda w: w.astype(jnp.float32)

    def causal_conv(p, cw):
        pad = jnp.pad(p, ((0, 0), (lorder - 1, 0), (0, 0)))
        return sum(pad[:, k:k + T, :] * cw[k][None, None, :] for k in range(lorder))

    def block(x, bw1, bb1, bw2, bcw):
        a = jax.nn.relu(jnp.einsum('btd,df->btf', x, f32(bw1)) + bb1)
        p = jnp.einsum('btd,df->btf', a, f32(bw2))
        return p + causal_conv(p, bcw)

    x = jax.nn.relu(jnp.einsum('btd,df->btf', feat, f32(w1)) + b1)
    enc = []
    for i in range(ew1.shape[0]):
        x = block(x, ew1[i], eb1[i], ew2[i], ecw[i])
        enc.append(x)
    for i in range(tw1.shape[0]):
        x = block(x, tw1[i], tb1[i], tw2[i], tcw[i])
    for i in range(dw1x.shape[0]):
        skip = enc[-1 - i]
        cat = jnp.concatenate([x, skip], axis=-1)                  # torch.cat([x, enc], -1)
        wfull = jnp.concatenate([f32(dw1x[i]), f32(dw1s[i])], axis=0)
        a = jax.nn.relu(jnp.einsum('btd,df->btf', cat, wfull) + db1[i])
        p = jnp.einsum('btd,df->btf', a, f32(dw2[i]))
        x = p + causal_conv(p, dcw[i])
    y = jnp.einsum('btd,df->btf', x, f32(w2)) + b2
    return jax.nn.sigmoid(y)


if __name__ == "__main__":
    # Small shapes consistent with the module (layers=9, 4 scales -> 3 enc + 3 tf + 3 dec).
    B, T = 2, 16
    indim, hidden, outdim = 16, 32, 8
    layers, lorder = 9, 4

    key = jax.random.PRNGKey(0)
    kf, kp = jax.random.split(key)
    feat = jax.random.normal(kf, (B, T, indim), jnp.float32)
    params = init_params(kp, indim, hidden, outdim, layers, lorder)

    out = unet_forward(feat, params, lorder=lorder)
    out = jax.block_until_ready(out)

    ref = unet_ref(feat, params, lorder=lorder)
    np.testing.assert_allclose(np.asarray(out), np.asarray(ref),
                               rtol=5e-3, atol=5e-3)
    assert out.shape == (B, T, outdim)
    print("KERNEL_OK")
</pallas_src>

<mosaic_0001>
module attributes {stable_mosaic.version = 11 : i64} {
  func.func @unet_kernel(%arg0: i32, %arg1: memref<1x16x16xf32, #tpu.memory_space<vmem>>, %arg2: memref<16x32xbf16, #tpu.memory_space<vmem>>, %arg3: memref<1x32xf32, #tpu.memory_space<vmem>>, %arg4: memref<3x32x32xbf16, #tpu.memory_space<vmem>>, %arg5: memref<3x1x32xf32, #tpu.memory_space<vmem>>, %arg6: memref<3x32x32xbf16, #tpu.memory_space<vmem>>, %arg7: memref<3x4x32xf32, #tpu.memory_space<vmem>>, %arg8: memref<3x32x32xbf16, #tpu.memory_space<vmem>>, %arg9: memref<3x1x32xf32, #tpu.memory_space<vmem>>, %arg10: memref<3x32x32xbf16, #tpu.memory_space<vmem>>, %arg11: memref<3x4x32xf32, #tpu.memory_space<vmem>>, %arg12: memref<3x32x32xbf16, #tpu.memory_space<vmem>>, %arg13: memref<3x32x32xbf16, #tpu.memory_space<vmem>>, %arg14: memref<3x1x32xf32, #tpu.memory_space<vmem>>, %arg15: memref<3x32x32xbf16, #tpu.memory_space<vmem>>, %arg16: memref<3x4x32xf32, #tpu.memory_space<vmem>>, %arg17: memref<32x8xbf16, #tpu.memory_space<vmem>>, %arg18: memref<1x8xf32, #tpu.memory_space<vmem>>, %arg19: memref<1x16x8xf32, #tpu.memory_space<vmem>>, %arg20: memref<19x32xf32, #tpu.memory_space<vmem>>) attributes {dimension_semantics = [#tpu.dimension_semantics<parallel>], iteration_bounds = array<i64: 2>, scalar_prefetch = 0 : i64, scratch_operands = 1 : i64, tpu.core_type = #tpu.core_type<tc>, window_params = [{transform_indices = @transform_0, window_bounds = array<i64: 1, 16, 16>}, {pipeline_mode = #tpu.pipeline_mode<synchronous>, transform_indices = @transform_1, window_bounds = array<i64: 16, 32>}, {pipeline_mode = #tpu.pipeline_mode<synchronous>, transform_indices = @transform_2, window_bounds = array<i64: 1, 32>}, {pipeline_mode = #tpu.pipeline_mode<synchronous>, transform_indices = @transform_3, window_bounds = array<i64: 3, 32, 32>}, {pipeline_mode = #tpu.pipeline_mode<synchronous>, transform_indices = @transform_4, window_bounds = array<i64: 3, 1, 32>}, {pipeline_mode = #tpu.pipeline_mode<synchronous>, transform_indices = @transform_5, window_bounds = array<i64: 3, 32, 32>}, {pipeline_mode = #tpu.pipeline_mode<synchronous>, transform_indices = @transform_6, window_bounds = array<i64: 3, 4, 32>}, {pipeline_mode = #tpu.pipeline_mode<synchronous>, transform_indices = @transform_7, window_bounds = array<i64: 3, 32, 32>}, {pipeline_mode = #tpu.pipeline_mode<synchronous>, transform_indices = @transform_8, window_bounds = array<i64: 3, 1, 32>}, {pipeline_mode = #tpu.pipeline_mode<synchronous>, transform_indices = @transform_9, window_bounds = array<i64: 3, 32, 32>}, {pipeline_mode = #tpu.pipeline_mode<synchronous>, transform_indices = @transform_10, window_bounds = array<i64: 3, 4, 32>}, {pipeline_mode = #tpu.pipeline_mode<synchronous>, transform_indices = @transform_11, window_bounds = array<i64: 3, 32, 32>}, {pipeline_mode = #tpu.pipeline_mode<synchronous>, transform_indices = @transform_12, window_bounds = array<i64: 3, 32, 32>}, {pipeline_mode = #tpu.pipeline_mode<synchronous>, transform_indices = @transform_13, window_bounds = array<i64: 3, 1, 32>}, {pipeline_mode = #tpu.pipeline_mode<synchronous>, transform_indices = @transform_14, window_bounds = array<i64: 3, 32, 32>}, {pipeline_mode = #tpu.pipeline_mode<synchronous>, transform_indices = @transform_15, window_bounds = array<i64: 3, 4, 32>}, {pipeline_mode = #tpu.pipeline_mode<synchronous>, transform_indices = @transform_16, window_bounds = array<i64: 32, 8>}, {pipeline_mode = #tpu.pipeline_mode<synchronous>, transform_indices = @transform_17, window_bounds = array<i64: 1, 8>}, {transform_indices = @transform_18, window_bounds = array<i64: 1, 16, 8>}]} {
    %cst = arith.constant 0.000000e+00 : f32
    %0 = vector.broadcast %cst : f32 to vector<3x32xf32>
    %c0 = arith.constant 0 : index
    %c0_0 = arith.constant 0 : index
    %1 = vector.load %arg20[%c0, %c0_0] : memref<19x32xf32, #tpu.memory_space<vmem>>, vector<3x32xf32>
    tpu.vector_store %arg20[%c0, %c0_0], %0 {strides = array<i32>} : memref<19x32xf32, #tpu.memory_space<vmem>>, vector<3x32xf32>,
    %c0_1 = arith.constant 0 : index
    %c0_2 = arith.constant 0 : index
    %c0_3 = arith.constant 0 : index
    %2 = vector.load %arg1[%c0_1, %c0_2, %c0_3] : memref<1x16x16xf32, #tpu.memory_space<vmem>>, vector<1x16x16xf32>
    %3 = vector.shape_cast %2 : vector<1x16x16xf32> to vector<16x16xf32>
    %c0_4 = arith.constant 0 : index
    %c0_5 = arith.constant 0 : index
    %4 = vector.load %arg2[%c0_4, %c0_5] : memref<16x32xbf16, #tpu.memory_space<vmem>>, vector<16x32xbf16>
    %cst_6 = arith.constant dense<0.000000e+00> : vector<16x32xf32>
    %5 = tpu.matmul %3, %4, %cst_6 {dimension_numbers = #tpu.dot_dimension_numbers<[1], [0], [0], [1], [0, 0, 1, 1], [], []>} : vector<16x16xf32>, vector<16x32xbf16>, vector<16x32xf32> -> vector<16x32xf32>
    %c0_7 = arith.constant 0 : index
    %c0_8 = arith.constant 0 : index
    %6 = vector.load %arg3[%c0_7, %c0_8] : memref<1x32xf32, #tpu.memory_space<vmem>>, vector<1x32xf32>
    %7 = vector.broadcast %6 : vector<1x32xf32> to vector<16x32xf32>
    %8 = arith.addf %5, %7 : vector<16x32xf32>
    %cst_9 = arith.constant 0.000000e+00 : f32
    %9 = vector.broadcast %cst_9 : f32 to vector<16x32xf32>
    %10 = arith.maximumf %8, %9 : vector<16x32xf32>
    %c0_10 = arith.constant 0 : index
    %c0_11 = arith.constant 0 : index
    %c0_12 = arith.constant 0 : index
    %11 = vector.load %arg4[%c0_10, %c0_11, %c0_12] : memref<3x32x32xbf16, #tpu.memory_space<vmem>>, vector<1x32x32xbf16>
    %12 = vector.shape_cast %11 : vector<1x32x32xbf16> to vector<32x32xbf16>
    %c0_13 = arith.constant 0 : index
    %c0_14 = arith.constant 0 : index
    %c0_15 = arith.constant 0 : index
    %13 = vector.load %arg5[%c0_13, %c0_14, %c0_15] : memref<3x1x32xf32, #tpu.memory_space<vmem>>, vector<1x1x32xf32>
    %14 = vector.shape_cast %13 : vector<1x1x32xf32> to vector<1x32xf32>
    %c0_16 = arith.constant 0 : index
    %c0_17 = arith.constant 0 : index
    %c0_18 = arith.constant 0 : index
    %15 = vector.load %arg6[%c0_16, %c0_17, %c0_18] : memref<3x32x32xbf16, #tpu.memory_space<vmem>>, vector<1x32x32xbf16>
    %16 = vector.shape_cast %15 : vector<1x32x32xbf16> to vector<32x32xbf16>
    %c0_19 = arith.constant 0 : index
    %c0_20 = arith.constant 0 : index
    %c0_21 = arith.constant 0 : index
    %17 = vector.load %arg7[%c0_19, %c0_20, %c0_21] : memref<3x4x32xf32, #tpu.memory_space<vmem>>, vector<1x4x32xf32>
    %18 = vector.shape_cast %17 : vector<1x4x32xf32> to vector<4x32xf32>
    %cst_22 = arith.constant dense<0.000000e+00> : vector<16x32xf32>
    %19 = tpu.matmul %10, %12, %cst_22 {dimension_numbers = #tpu.dot_dimension_numbers<[1], [0], [0], [1], [0, 0, 1, 1], [], []>} : vector<16x32xf32>, vector<32x32xbf16>, vector<16x32xf32> -> vector<16x32xf32>
    %20 = vector.broadcast %14 : vector<1x32xf32> to vector<16x32xf32>
    %21 = arith.addf %19, %20 : vector<16x32xf32>
    %cst_23 = arith.constant 0.000000e+00 : f32
    %22 = vector.broadcast %cst_23 : f32 to vector<16x32xf32>
    %23 = arith.maximumf %21, %22 : vector<16x32xf32>
    %cst_24 = arith.constant dense<0.000000e+00> : vector<16x32xf32>
    %24 = tpu.matmul %23, %16, %cst_24 {dimension_numbers = #tpu.dot_dimension_numbers<[1], [0], [0], [1], [0, 0, 1, 1], [], []>} : vector<16x32xf32>, vector<32x32xbf16>, vector<16x32xf32> -> vector<16x32xf32>
    %c3 = arith.constant 3 : index
    %c0_25 = arith.constant 0 : index
    %25 = vector.load %arg20[%c3, %c0_25] : memref<19x32xf32, #tpu.memory_space<vmem>>, vector<16x32xf32>
    tpu.vector_store %arg20[%c3, %c0_25], %24 {strides = array<i32>} : memref<19x32xf32, #tpu.memory_space<vmem>>, vector<16x32xf32>,
    %26 = vector.extract_strided_slice %18 {offsets = [3, 0], sizes = [1, 32], strides = [1, 1]} : vector<4x32xf32> to vector<1x32xf32>
    %27 = vector.broadcast %26 : vector<1x32xf32> to vector<16x32xf32>
    %28 = arith.mulf %24, %27 : vector<16x32xf32>
    %c0_26 = arith.constant 0 : index
    %c0_27 = arith.constant 0 : index
    %29 = vector.load %arg20[%c0_26, %c0_27] : memref<19x32xf32, #tpu.memory_space<vmem>>, vector<16x32xf32>
    %30 = vector.extract_strided_slice %18 {offsets = [0, 0], sizes = [1, 32], strides = [1, 1]} : vector<4x32xf32> to vector<1x32xf32>
    %31 = vector.broadcast %30 : vector<1x32xf32> to vector<16x32xf32>
    %32 = arith.mulf %29, %31 : vector<16x32xf32>
    %33 = arith.addf %28, %32 : vector<16x32xf32>
    %c1 = arith.constant 1 : index
    %c0_28 = arith.constant 0 : index
    %34 = vector.load %arg20[%c1, %c0_28] : memref<19x32xf32, #tpu.memory_space<vmem>>, vector<16x32xf32>
    %35 = vector.extract_strided_slice %18 {offsets = [1, 0], sizes = [1, 32], strides = [1, 1]} : vector<4x32xf32> to vector<1x32xf32>
    %36 = vector.broadcast %35 : vector<1x32xf32> to vector<16x32xf32>
    %37 = arith.mulf %34, %36 : vector<16x32xf32>
    %38 = arith.addf %33, %37 : vector<16x32xf32>
    %c2 = arith.constant 2 : index
    %c0_29 = arith.constant 0 : index
    %39 = vector.load %arg20[%c2, %c0_29] : memref<19x32xf32, #tpu.memory_space<vmem>>, vector<16x32xf32>
    %40 = vector.extract_strided_slice %18 {offsets = [2, 0], sizes = [1, 32], strides = [1, 1]} : vector<4x32xf32> to vector<1x32xf32>
    %41 = vector.broadcast %40 : vector<1x32xf32> to vector<16x32xf32>
    %42 = arith.mulf %39, %41 : vector<16x32xf32>
    %43 = arith.addf %38, %42 : vector<16x32xf32>
    %44 = arith.addf %24, %43 : vector<16x32xf32>
    %c1_30 = arith.constant 1 : index
    %c0_31 = arith.constant 0 : index
    %c0_32 = arith.constant 0 : index
    %45 = vector.load %arg4[%c1_30, %c0_31, %c0_32] : memref<3x32x32xbf16, #tpu.memory_space<vmem>>, vector<1x32x32xbf16>
    %46 = vector.shape_cast %45 : vector<1x32x32xbf16> to vector<32x32xbf16>
    %c1_33 = arith.constant 1 : index
    %c0_34 = arith.constant 0 : index
    %c0_35 = arith.constant 0 : index
    %47 = vector.load %arg5[%c1_33, %c0_34, %c0_35] : memref<3x1x32xf32, #tpu.memory_space<vmem>>, vector<1x1x32xf32>
    %48 = vector.shape_cast %47 : vector<1x1x32xf32> to vector<1x32xf32>
    %c1_36 = arith.constant 1 : index
    %c0_37 = arith.constant 0 : index
    %c0_38 = arith.constant 0 : index
    %49 = vector.load %arg6[%c1_36, %c0_37, %c0_38] : memref<3x32x32xbf16, #tpu.memory_space<vmem>>, vector<1x32x32xbf16>
    %50 = vector.shape_cast %49 : vector<1x32x32xbf16> to vector<32x32xbf16>
    %c1_39 = arith.constant 1 : index
    %c0_40 = arith.constant 0 : index
    %c0_41 = arith.constant 0 : index
    %51 = vector.load %arg7[%c1_39, %c0_40, %c0_41] : memref<3x4x32xf32, #tpu.memory_space<vmem>>, vector<1x4x32xf32>
    %52 = vector.shape_cast %51 : vector<1x4x32xf32> to vector<4x32xf32>
    %cst_42 = arith.constant dense<0.000000e+00> : vector<16x32xf32>
    %53 = tpu.matmul %44, %46, %cst_42 {dimension_numbers = #tpu.dot_dimension_numbers<[1], [0], [0], [1], [0, 0, 1, 1], [], []>} : vector<16x32xf32>, vector<32x32xbf16>, vector<16x32xf32> -> vector<16x32xf32>
    %54 = vector.broadcast %48 : vector<1x32xf32> to vector<16x32xf32>
    %55 = arith.addf %53, %54 : vector<16x32xf32>
    %cst_43 = arith.constant 0.000000e+00 : f32
    %56 = vector.broadcast %cst_43 : f32 to vector<16x32xf32>
    %57 = arith.maximumf %55, %56 : vector<16x32xf32>
    %cst_44 = arith.constant dense<0.000000e+00> : vector<16x32xf32>
    %58 = tpu.matmul %57, %50, %cst_44 {dimension_numbers = #tpu.dot_dimension_numbers<[1], [0], [0], [1], [0, 0, 1, 1], [], []>} : vector<16x32xf32>, vector<32x32xbf16>, vector<16x32xf32> -> vector<16x32xf32>
    %c3_45 = arith.constant 3 : index
    %c0_46 = arith.constant 0 : index
    %59 = vector.load %arg20[%c3_45, %c0_46] : memref<19x32xf32, #tpu.memory_space<vmem>>, vector<16x32xf32>
    tpu.vector_store %arg20[%c3_45, %c0_46], %58 {strides = array<i32>} : memref<19x32xf32, #tpu.memory_space<vmem>>, vector<16x32xf32>,
    %60 = vector.extract_strided_slice %52 {offsets = [3, 0], sizes = [1, 32], strides = [1, 1]} : vector<4x32xf32> to vector<1x32xf32>
    %61 = vector.broadcast %60 : vector<1x32xf32> to vector<16x32xf32>
    %62 = arith.mulf %58, %61 : vector<16x32xf32>
    %c0_47 = arith.constant 0 : index
    %c0_48 = arith.constant 0 : index
    %63 = vector.load %arg20[%c0_47, %c0_48] : memref<19x32xf32, #tpu.memory_space<vmem>>, vector<16x32xf32>
    %64 = vector.extract_strided_slice %52 {offsets = [0, 0], sizes = [1, 32], strides = [1, 1]} : vector<4x32xf32> to vector<1x32xf32>
    %65 = vector.broadcast %64 : vector<1x32xf32> to vector<16x32xf32>
    %66 = arith.mulf %63, %65 : vector<16x32xf32>
    %67 = arith.addf %62, %66 : vector<16x32xf32>
    %c1_49 = arith.constant 1 : index
    %c0_50 = arith.constant 0 : index
    %68 = vector.load %arg20[%c1_49, %c0_50] : memref<19x32xf32, #tpu.memory_space<vmem>>, vector<16x32xf32>
    %69 = vector.extract_strided_slice %52 {offsets = [1, 0], sizes = [1, 32], strides = [1, 1]} : vector<4x32xf32> to vector<1x32xf32>
    %70 = vector.broadcast %69 : vector<1x32xf32> to vector<16x32xf32>
    %71 = arith.mulf %68, %70 : vector<16x32xf32>
    %72 = arith.addf %67, %71 : vector<16x32xf32>
    %c2_51 = arith.constant 2 : index
    %c0_52 = arith.constant 0 : index
    %73 = vector.load %arg20[%c2_51, %c0_52] : memref<19x32xf32, #tpu.memory_space<vmem>>, vector<16x32xf32>
    %74 = vector.extract_strided_slice %52 {offsets = [2, 0], sizes = [1, 32], strides = [1, 1]} : vector<4x32xf32> to vector<1x32xf32>
    %75 = vector.broadcast %74 : vector<1x32xf32> to vector<16x32xf32>
    %76 = arith.mulf %73, %75 : vector<16x32xf32>
    %77 = arith.addf %72, %76 : vector<16x32xf32>
    %78 = arith.addf %58, %77 : vector<16x32xf32>
    %c2_53 = arith.constant 2 : index
    %c0_54 = arith.constant 0 : index
    %c0_55 = arith.constant 0 : index
    %79 = vector.load %arg4[%c2_53, %c0_54, %c0_55] : memref<3x32x32xbf16, #tpu.memory_space<vmem>>, vector<1x32x32xbf16>
    %80 = vector.shape_cast %79 : vector<1x32x32xbf16> to vector<32x32xbf16>
    %c2_56 = arith.constant 2 : index
    %c0_57 = arith.constant 0 : index
    %c0_58 = arith.constant 0 : index
    %81 = vector.load %arg5[%c2_56, %c0_57, %c0_58] : memref<3x1x32xf32, #tpu.memory_space<vmem>>, vector<1x1x32xf32>
    %82 = vector.shape_cast %81 : vector<1x1x32xf32> to vector<1x32xf32>
    %c2_59 = arith.constant 2 : index
    %c0_60 = arith.constant 0 : index
    %c0_61 = arith.constant 0 : index
    %83 = vector.load %arg6[%c2_59, %c0_60, %c0_61] : memref<3x32x32xbf16, #tpu.memory_space<vmem>>, vector<1x32x32xbf16>
    %84 = vector.shape_cast %83 : vector<1x32x32xbf16> to vector<32x32xbf16>
    %c2_62 = arith.constant 2 : index
    %c0_63 = arith.constant 0 : index
    %c0_64 = arith.constant 0 : index
    %85 = vector.load %arg7[%c2_62, %c0_63, %c0_64] : memref<3x4x32xf32, #tpu.memory_space<vmem>>, vector<1x4x32xf32>
    %86 = vector.shape_cast %85 : vector<1x4x32xf32> to vector<4x32xf32>
    %cst_65 = arith.constant dense<0.000000e+00> : vector<16x32xf32>
    %87 = tpu.matmul %78, %80, %cst_65 {dimension_numbers = #tpu.dot_dimension_numbers<[1], [0], [0], [1], [0, 0, 1, 1], [], []>} : vector<16x32xf32>, vector<32x32xbf16>, vector<16x32xf32> -> vector<16x32xf32>
    %88 = vector.broadcast %82 : vector<1x32xf32> to vector<16x32xf32>
    %89 = arith.addf %87, %88 : vector<16x32xf32>
    %cst_66 = arith.constant 0.000000e+00 : f32
    %90 = vector.broadcast %cst_66 : f32 to vector<16x32xf32>
    %91 = arith.maximumf %89, %90 : vector<16x32xf32>
    %cst_67 = arith.constant dense<0.000000e+00> : vector<16x32xf32>
    %92 = tpu.matmul %91, %84, %cst_67 {dimension_numbers = #tpu.dot_dimension_numbers<[1], [0], [0], [1], [0, 0, 1, 1], [], []>} : vector<16x32xf32>, vector<32x32xbf16>, vector<16x32xf32> -> vector<16x32xf32>
    %c3_68 = arith.constant 3 : index
    %c0_69 = arith.constant 0 : index
    %93 = vector.load %arg20[%c3_68, %c0_69] : memref<19x32xf32, #tpu.memory_space<vmem>>, vector<16x32xf32>
    tpu.vector_store %arg20[%c3_68, %c0_69], %92 {strides = array<i32>} : memref<19x32xf32, #tpu.memory_space<vmem>>, vector<16x32xf32>,
    %94 = vector.extract_strided_slice %86 {offsets = [3, 0], sizes = [1, 32], strides = [1, 1]} : vector<4x32xf32> to vector<1x32xf32>
    %95 = vector.broadcast %94 : vector<1x32xf32> to vector<16x32xf32>
    %96 = arith.mulf %92, %95 : vector<16x32xf32>
    %c0_70 = arith.constant 0 : index
    %c0_71 = arith.constant 0 : index
    %97 = vector.load %arg20[%c0_70, %c0_71] : memref<19x32xf32, #tpu.memory_space<vmem>>, vector<16x32xf32>
    %98 = vector.extract_strided_slice %86 {offsets = [0, 0], sizes = [1, 32], strides = [1, 1]} : vector<4x32xf32> to vector<1x32xf32>
    %99 = vector.broadcast %98 : vector<1x32xf32> to vector<16x32xf32>
    %100 = arith.mulf %97, %99 : vector<16x32xf32>
    %101 = arith.addf %96, %100 : vector<16x32xf32>
    %c1_72 = arith.constant 1 : index
    %c0_73 = arith.constant 0 : index
    %102 = vector.load %arg20[%c1_72, %c0_73] : memref<19x32xf32, #tpu.memory_space<vmem>>, vector<16x32xf32>
    %103 = vector.extract_strided_slice %86 {offsets = [1, 0], sizes = [1, 32], strides = [1, 1]} : vector<4x32xf32> to vector<1x32xf32>
    %104 = vector.broadcast %103 : vector<1x32xf32> to vector<16x32xf32>
    %105 = arith.mulf %102, %104 : vector<16x32xf32>
    %106 = arith.addf %101, %105 : vector<16x32xf32>
    %c2_74 = arith.constant 2 : index
    %c0_75 = arith.constant 0 : index
    %107 = vector.load %arg20[%c2_74, %c0_75] : memref<19x32xf32, #tpu.memory_space<vmem>>, vector<16x32xf32>
    %108 = vector.extract_strided_slice %86 {offsets = [2, 0], sizes = [1, 32], strides = [1, 1]} : vector<4x32xf32> to vector<1x32xf32>
    %109 = vector.broadcast %108 : vector<1x32xf32> to vector<16x32xf32>
    %110 = arith.mulf %107, %109 : vector<16x32xf32>
    %111 = arith.addf %106, %110 : vector<16x32xf32>
    %112 = arith.addf %92, %111 : vector<16x32xf32>
    %c0_76 = arith.constant 0 : index
    %c0_77 = arith.constant 0 : index
    %c0_78 = arith.constant 0 : index
    %113 = vector.load %arg8[%c0_76, %c0_77, %c0_78] : memref<3x32x32xbf16, #tpu.memory_space<vmem>>, vector<1x32x32xbf16>
    %114 = vector.shape_cast %113 : vector<1x32x32xbf16> to vector<32x32xbf16>
    %c0_79 = arith.constant 0 : index
    %c0_80 = arith.constant 0 : index
    %c0_81 = arith.constant 0 : index
    %115 = vector.load %arg9[%c0_79, %c0_80, %c0_81] : memref<3x1x32xf32, #tpu.memory_space<vmem>>, vector<1x1x32xf32>
    %116 = vector.shape_cast %115 : vector<1x1x32xf32> to vector<1x32xf32>
    %c0_82 = arith.constant 0 : index
    %c0_83 = arith.constant 0 : index
    %c0_84 = arith.constant 0 : index
    %117 = vector.load %arg10[%c0_82, %c0_83, %c0_84] : memref<3x32x32xbf16, #tpu.memory_space<vmem>>, vector<1x32x32xbf16>
    %118 = vector.shape_cast %117 : vector<1x32x32xbf16> to vector<32x32xbf16>
    %c0_85 = arith.constant 0 : index
    %c0_86 = arith.constant 0 : index
    %c0_87 = arith.constant 0 : index
    %119 = vector.load %arg11[%c0_85, %c0_86, %c0_87] : memref<3x4x32xf32, #tpu.memory_space<vmem>>, vector<1x4x32xf32>
    %120 = vector.shape_cast %119 : vector<1x4x32xf32> to vector<4x32xf32>
    %cst_88 = arith.constant dense<0.000000e+00> : vector<16x32xf32>
    %121 = tpu.matmul %112, %114, %cst_88 {dimension_numbers = #tpu.dot_dimension_numbers<[1], [0], [0], [1], [0, 0, 1, 1], [], []>} : vector<16x32xf32>, vector<32x32xbf16>, vector<16x32xf32> -> vector<16x32xf32>
    %122 = vector.broadcast %116 : vector<1x32xf32> to vector<16x32xf32>
    %123 = arith.addf %121, %122 : vector<16x32xf32>
    %cst_89 = arith.constant 0.000000e+00 : f32
    %124 = vector.broadcast %cst_89 : f32 to vector<16x32xf32>
    %125 = arith.maximumf %123, %124 : vector<16x32xf32>
    %cst_90 = arith.constant dense<0.000000e+00> : vector<16x32xf32>
    %126 = tpu.matmul %125, %118, %cst_90 {dimension_numbers = #tpu.dot_dimension_numbers<[1], [0], [0], [1], [0, 0, 1, 1], [], []>} : vector<16x32xf32>, vector<32x32xbf16>, vector<16x32xf32> -> vector<16x32xf32>
    %c3_91 = arith.constant 3 : index
    %c0_92 = arith.constant 0 : index
    %127 = vector.load %arg20[%c3_91, %c0_92] : memref<19x32xf32, #tpu.memory_space<vmem>>, vector<16x32xf32>
    tpu.vector_store %arg20[%c3_91, %c0_92], %126 {strides = array<i32>} : memref<19x32xf32, #tpu.memory_space<vmem>>, vector<16x32xf32>,
    %128 = vector.extract_strided_slice %120 {offsets = [3, 0], sizes = [1, 32], strides = [1, 1]} : vector<4x32xf32> to vector<1x32xf32>
    %129 = vector.broadcast %128 : vector<1x32xf32> to vector<16x32xf32>
    %130 = arith.mulf %126, %129 : vector<16x32xf32>
    %c0_93 = arith.constant 0 : index
    %c0_94 = arith.constant 0 : index
    %131 = vector.load %arg20[%c0_93, %c0_94] : memref<19x32xf32, #tpu.memory_space<vmem>>, vector<16x32xf32>
    %132 = vector.extract_strided_slice %120 {offsets = [0, 0], sizes = [1, 32], strides = [1, 1]} : vector<4x32xf32> to vector<1x32xf32>
    %133 = vector.broadcast %132 : vector<1x32xf32> to vector<16x32xf32>
    %134 = arith.mulf %131, %133 : vector<16x32xf32>
    %135 = arith.addf %130, %134 : vector<16x32xf32>
    %c1_95 = arith.constant 1 : index
    %c0_96 = arith.constant 0 : index
    %136 = vector.load %arg20[%c1_95, %c0_96] : memref<19x32xf32, #tpu.memory_space<vmem>>, vector<16x32xf32>
    %137 = vector.extract_strided_slice %120 {offsets = [1, 0], sizes = [1, 32], strides = [1, 1]} : vector<4x32xf32> to vector<1x32xf32>
    %138 = vector.broadcast %137 : vector<1x32xf32> to vector<16x32xf32>
    %139 = arith.mulf %136, %138 : vector<16x32xf32>
    %140 = arith.addf %135, %139 : vector<16x32xf32>
    %c2_97 = arith.constant 2 : index
    %c0_98 = arith.constant 0 : index
    %141 = vector.load %arg20[%c2_97, %c0_98] : memref<19x32xf32, #tpu.memory_space<vmem>>, vector<16x32xf32>
    %142 = vector.extract_strided_slice %120 {offsets = [2, 0], sizes = [1, 32], strides = [1, 1]} : vector<4x32xf32> to vector<1x32xf32>
    %143 = vector.broadcast %142 : vector<1x32xf32> to vector<16x32xf32>
    %144 = arith.mulf %141, %143 : vector<16x32xf32>
    %145 = arith.addf %140, %144 : vector<16x32xf32>
    %146 = arith.addf %126, %145 : vector<16x32xf32>
    %c1_99 = arith.constant 1 : index
    %c0_100 = arith.constant 0 : index
    %c0_101 = arith.constant 0 : index
    %147 = vector.load %arg8[%c1_99, %c0_100, %c0_101] : memref<3x32x32xbf16, #tpu.memory_space<vmem>>, vector<1x32x32xbf16>
    %148 = vector.shape_cast %147 : vector<1x32x32xbf16> to vector<32x32xbf16>
    %c1_102 = arith.constant 1 : index
    %c0_103 = arith.constant 0 : index
    %c0_104 = arith.constant 0 : index
    %149 = vector.load %arg9[%c1_102, %c0_103, %c0_104] : memref<3x1x32xf32, #tpu.memory_space<vmem>>, vector<1x1x32xf32>
    %150 = vector.shape_cast %149 : vector<1x1x32xf32> to vector<1x32xf32>
    %c1_105 = arith.constant 1 : index
    %c0_106 = arith.constant 0 : index
    %c0_107 = arith.constant 0 : index
    %151 = vector.load %arg10[%c1_105, %c0_106, %c0_107] : memref<3x32x32xbf16, #tpu.memory_space<vmem>>, vector<1x32x32xbf16>
    %152 = vector.shape_cast %151 : vector<1x32x32xbf16> to vector<32x32xbf16>
    %c1_108 = arith.constant 1 : index
    %c0_109 = arith.constant 0 : index
    %c0_110 = arith.constant 0 : index
    %153 = vector.load %arg11[%c1_108, %c0_109, %c0_110] : memref<3x4x32xf32, #tpu.memory_space<vmem>>, vector<1x4x32xf32>
    %154 = vector.shape_cast %153 : vector<1x4x32xf32> to vector<4x32xf32>
    %cst_111 = arith.constant dense<0.000000e+00> : vector<16x32xf32>
    %155 = tpu.matmul %146, %148, %cst_111 {dimension_numbers = #tpu.dot_dimension_numbers<[1], [0], [0], [1], [0, 0, 1, 1], [], []>} : vector<16x32xf32>, vector<32x32xbf16>, vector<16x32xf32> -> vector<16x32xf32>
    %156 = vector.broadcast %150 : vector<1x32xf32> to vector<16x32xf32>
    %157 = arith.addf %155, %156 : vector<16x32xf32>
    %cst_112 = arith.constant 0.000000e+00 : f32
    %158 = vector.broadcast %cst_112 : f32 to vector<16x32xf32>
    %159 = arith.maximumf %157, %158 : vector<16x32xf32>
    %cst_113 = arith.constant dense<0.000000e+00> : vector<16x32xf32>
    %160 = tpu.matmul %159, %152, %cst_113 {dimension_numbers = #tpu.dot_dimension_numbers<[1], [0], [0], [1], [0, 0, 1, 1], [], []>} : vector<16x32xf32>, vector<32x32xbf16>, vector<16x32xf32> -> vector<16x32xf32>
    %c3_114 = arith.constant 3 : index
    %c0_115 = arith.constant 0 : index
    %161 = vector.load %arg20[%c3_114, %c0_115] : memref<19x32xf32, #tpu.memory_space<vmem>>, vector<16x32xf32>
    tpu.vector_store %arg20[%c3_114, %c0_115], %160 {strides = array<i32>} : memref<19x32xf32, #tpu.memory_space<vmem>>, vector<16x32xf32>,
    %162 = vector.extract_strided_slice %154 {offsets = [3, 0], sizes = [1, 32], strides = [1, 1]} : vector<4x32xf32> to vector<1x32xf32>
    %163 = vector.broadcast %162 : vector<1x32xf32> to vector<16x32xf32>
    %164 = arith.mulf %160, %163 : vector<16x32xf32>
    %c0_116 = arith.constant 0 : index
    %c0_117 = arith.constant 0 : index
    %165 = vector.load %arg20[%c0_116, %c0_117] : memref<19x32xf32, #tpu.memory_space<vmem>>, vector<16x32xf32>
    %166 = vector.extract_strided_slice %154 {offsets = [0, 0], sizes = [1, 32], strides = [1, 1]} : vector<4x32xf32> to vector<1x32xf32>
    %167 = vector.broadcast %166 : vector<1x32xf32> to vector<16x32xf32>
    %168 = arith.mulf %165, %167 : vector<16x32xf32>
    %169 = arith.addf %164, %168 : vector<16x32xf32>
    %c1_118 = arith.constant 1 : index
    %c0_119 = arith.constant 0 : index
    %170 = vector.load %arg20[%c1_118, %c0_119] : memref<19x32xf32, #tpu.memory_space<vmem>>, vector<16x32xf32>
    %171 = vector.extract_strided_slice %154 {offsets = [1, 0], sizes = [1, 32], strides = [1, 1]} : vector<4x32xf32> to vector<1x32xf32>
    %172 = vector.broadcast %171 : vector<1x32xf32> to vector<16x32xf32>
    %173 = arith.mulf %170, %172 : vector<16x32xf32>
    %174 = arith.addf %169, %173 : vector<16x32xf32>
    %c2_120 = arith.constant 2 : index
    %c0_121 = arith.constant 0 : index
    %175 = vector.load %arg20[%c2_120, %c0_121] : memref<19x32xf32, #tpu.memory_space<vmem>>, vector<16x32xf32>
    %176 = vector.extract_strided_slice %154 {offsets = [2, 0], sizes = [1, 32], strides = [1, 1]} : vector<4x32xf32> to vector<1x32xf32>
    %177 = vector.broadcast %176 : vector<1x32xf32> to vector<16x32xf32>
    %178 = arith.mulf %175, %177 : vector<16x32xf32>
    %179 = arith.addf %174, %178 : vector<16x32xf32>
    %180 = arith.addf %160, %179 : vector<16x32xf32>
    %c2_122 = arith.constant 2 : index
    %c0_123 = arith.constant 0 : index
    %c0_124 = arith.constant 0 : index
    %181 = vector.load %arg8[%c2_122, %c0_123, %c0_124] : memref<3x32x32xbf16, #tpu.memory_space<vmem>>, vector<1x32x32xbf16>
    %182 = vector.shape_cast %181 : vector<1x32x32xbf16> to vector<32x32xbf16>
    %c2_125 = arith.constant 2 : index
    %c0_126 = arith.constant 0 : index
    %c0_127 = arith.constant 0 : index
    %183 = vector.load %arg9[%c2_125, %c0_126, %c0_127] : memref<3x1x32xf32, #tpu.memory_space<vmem>>, vector<1x1x32xf32>
    %184 = vector.shape_cast %183 : vector<1x1x32xf32> to vector<1x32xf32>
    %c2_128 = arith.constant 2 : index
    %c0_129 = arith.constant 0 : index
    %c0_130 = arith.constant 0 : index
    %185 = vector.load %arg10[%c2_128, %c0_129, %c0_130] : memref<3x32x32xbf16, #tpu.memory_space<vmem>>, vector<1x32x32xbf16>
    %186 = vector.shape_cast %185 : vector<1x32x32xbf16> to vector<32x32xbf16>
    %c2_131 = arith.constant 2 : index
    %c0_132 = arith.constant 0 : index
    %c0_133 = arith.constant 0 : index
    %187 = vector.load %arg11[%c2_131, %c0_132, %c0_133] : memref<3x4x32xf32, #tpu.memory_space<vmem>>, vector<1x4x32xf32>
    %188 = vector.shape_cast %187 : vector<1x4x32xf32> to vector<4x32xf32>
    %cst_134 = arith.constant dense<0.000000e+00> : vector<16x32xf32>
    %189 = tpu.matmul %180, %182, %cst_134 {dimension_numbers = #tpu.dot_dimension_numbers<[1], [0], [0], [1], [0, 0, 1, 1], [], []>} : vector<16x32xf32>, vector<32x32xbf16>, vector<16x32xf32> -> vector<16x32xf32>
    %190 = vector.broadcast %184 : vector<1x32xf32> to vector<16x32xf32>
    %191 = arith.addf %189, %190 : vector<16x32xf32>
    %cst_135 = arith.constant 0.000000e+00 : f32
    %192 = vector.broadcast %cst_135 : f32 to vector<16x32xf32>
    %193 = arith.maximumf %191, %192 : vector<16x32xf32>
    %cst_136 = arith.constant dense<0.000000e+00> : vector<16x32xf32>
    %194 = tpu.matmul %193, %186, %cst_136 {dimension_numbers = #tpu.dot_dimension_numbers<[1], [0], [0], [1], [0, 0, 1, 1], [], []>} : vector<16x32xf32>, vector<32x32xbf16>, vector<16x32xf32> -> vector<16x32xf32>
    %c3_137 = arith.constant 3 : index
    %c0_138 = arith.constant 0 : index
    %195 = vector.load %arg20[%c3_137, %c0_138] : memref<19x32xf32, #tpu.memory_space<vmem>>, vector<16x32xf32>
    tpu.vector_store %arg20[%c3_137, %c0_138], %194 {strides = array<i32>} : memref<19x32xf32, #tpu.memory_space<vmem>>, vector<16x32xf32>,
    %196 = vector.extract_strided_slice %188 {offsets = [3, 0], sizes = [1, 32], strides = [1, 1]} : vector<4x32xf32> to vector<1x32xf32>
    %197 = vector.broadcast %196 : vector<1x32xf32> to vector<16x32xf32>
    %198 = arith.mulf %194, %197 : vector<16x32xf32>
    %c0_139 = arith.constant 0 : index
    %c0_140 = arith.constant 0 : index
    %199 = vector.load %arg20[%c0_139, %c0_140] : memref<19x32xf32, #tpu.memory_space<vmem>>, vector<16x32xf32>
    %200 = vector.extract_strided_slice %188 {offsets = [0, 0], sizes = [1, 32], strides = [1, 1]} : vector<4x32xf32> to vector<1x32xf32>
    %201 = vector.broadcast %200 : vector<1x32xf32> to vector<16x32xf32>
    %202 = arith.mulf %199, %201 : vector<16x32xf32>
    %203 = arith.addf %198, %202 : vector<16x32xf32>
    %c1_141 = arith.constant 1 : index
    %c0_142 = arith.constant 0 : index
    %204 = vector.load %arg20[%c1_141, %c0_142] : memref<19x32xf32, #tpu.memory_space<vmem>>, vector<16x32xf32>
    %205 = vector.extract_strided_slice %188 {offsets = [1, 0], sizes = [1, 32], strides = [1, 1]} : vector<4x32xf32> to vector<1x32xf32>
    %206 = vector.broadcast %205 : vector<1x32xf32> to vector<16x32xf32>
    %207 = arith.mulf %204, %206 : vector<16x32xf32>
    %208 = arith.addf %203, %207 : vector<16x32xf32>
    %c2_143 = arith.constant 2 : index
    %c0_144 = arith.constant 0 : index
    %209 = vector.load %arg20[%c2_143, %c0_144] : memref<19x32xf32, #tpu.memory_space<vmem>>, vector<16x32xf32>
    %210 = vector.extract_strided_slice %188 {offsets = [2, 0], sizes = [1, 32], strides = [1, 1]} : vector<4x32xf32> to vector<1x32xf32>
    %211 = vector.broadcast %210 : vector<1x32xf32> to vector<16x32xf32>
    %212 = arith.mulf %209, %211 : vector<16x32xf32>
    %213 = arith.addf %208, %212 : vector<16x32xf32>
    %214 = arith.addf %194, %213 : vector<16x32xf32>
    %c0_145 = arith.constant 0 : index
    %c0_146 = arith.constant 0 : index
    %c0_147 = arith.constant 0 : index
    %215 = vector.load %arg12[%c0_145, %c0_146, %c0_147] : memref<3x32x32xbf16, #tpu.memory_space<vmem>>, vector<1x32x32xbf16>
    %216 = vector.shape_cast %215 : vector<1x32x32xbf16> to vector<32x32xbf16>
    %cst_148 = arith.constant dense<0.000000e+00> : vector<16x32xf32>
    %217 = tpu.matmul %214, %216, %cst_148 {dimension_numbers = #tpu.dot_dimension_numbers<[1], [0], [0], [1], [0, 0, 1, 1], [], []>} : vector<16x32xf32>, vector<32x32xbf16>, vector<16x32xf32> -> vector<16x32xf32>
    %c0_149 = arith.constant 0 : index
    %c0_150 = arith.constant 0 : index
    %c0_151 = arith.constant 0 : index
    %218 = vector.load %arg13[%c0_149, %c0_150, %c0_151] : memref<3x32x32xbf16, #tpu.memory_space<vmem>>, vector<1x32x32xbf16>
    %219 = vector.shape_cast %218 : vector<1x32x32xbf16> to vector<32x32xbf16>
    %cst_152 = arith.constant dense<0.000000e+00> : vector<16x32xf32>
    %220 = tpu.matmul %112, %219, %cst_152 {dimension_numbers = #tpu.dot_dimension_numbers<[1], [0], [0], [1], [0, 0, 1, 1], [], []>} : vector<16x32xf32>, vector<32x32xbf16>, vector<16x32xf32> -> vector<16x32xf32>
    %221 = arith.addf %217, %220 : vector<16x32xf32>
    %c0_153 = arith.constant 0 : index
    %c0_154 = arith.constant 0 : index
    %c0_155 = arith.constant 0 : index
    %222 = vector.load %arg14[%c0_153, %c0_154, %c0_155] : memref<3x1x32xf32, #tpu.memory_space<vmem>>, vector<1x1x32xf32>
    %223 = vector.shape_cast %222 : vector<1x1x32xf32> to vector<1x32xf32>
    %224 = vector.broadcast %223 : vector<1x32xf32> to vector<16x32xf32>
    %225 = arith.addf %221, %224 : vector<16x32xf32>
    %cst_156 = arith.constant 0.000000e+00 : f32
    %226 = vector.broadcast %cst_156 : f32 to vector<16x32xf32>
    %227 = arith.maximumf %225, %226 : vector<16x32xf32>
    %c0_157 = arith.constant 0 : index
    %c0_158 = arith.constant 0 : index
    %c0_159 = arith.constant 0 : index
    %228 = vector.load %arg15[%c0_157, %c0_158, %c0_159] : memref<3x32x32xbf16, #tpu.memory_space<vmem>>, vector<1x32x32xbf16>
    %229 = vector.shape_cast %228 : vector<1x32x32xbf16> to vector<32x32xbf16>
    %cst_160 = arith.constant dense<0.000000e+00> : vector<16x32xf32>
    %230 = tpu.matmul %227, %229, %cst_160 {dimension_numbers = #tpu.dot_dimension_numbers<[1], [0], [0], [1], [0, 0, 1, 1], [], []>} : vector<16x32xf32>, vector<32x32xbf16>, vector<16x32xf32> -> vector<16x32xf32>
    %c0_161 = arith.constant 0 : index
    %c0_162 = arith.constant 0 : index
    %c0_163 = arith.constant 0 : index
    %231 = vector.load %arg16[%c0_161, %c0_162, %c0_163] : memref<3x4x32xf32, #tpu.memory_space<vmem>>, vector<1x4x32xf32>
    %232 = vector.shape_cast %231 : vector<1x4x32xf32> to vector<4x32xf32>
    %c3_164 = arith.constant 3 : index
    %c0_165 = arith.constant 0 : index
    %233 = vector.load %arg20[%c3_164, %c0_165] : memref<19x32xf32, #tpu.memory_space<vmem>>, vector<16x32xf32>
    tpu.vector_store %arg20[%c3_164, %c0_165], %230 {strides = array<i32>} : memref<19x32xf32, #tpu.memory_space<vmem>>, vector<16x32xf32>,
    %234 = vector.extract_strided_slice %232 {offsets = [3, 0], sizes = [1, 32], strides = [1, 1]} : vector<4x32xf32> to vector<1x32xf32>
    %235 = vector.broadcast %234 : vector<1x32xf32> to vector<16x32xf32>
    %236 = arith.mulf %230, %235 : vector<16x32xf32>
    %c0_166 = arith.constant 0 : index
    %c0_167 = arith.constant 0 : index
    %237 = vector.load %arg20[%c0_166, %c0_167] : memref<19x32xf32, #tpu.memory_space<vmem>>, vector<16x32xf32>
    %238 = vector.extract_strided_slice %232 {offsets = [0, 0], sizes = [1, 32], strides = [1, 1]} : vector<4x32xf32> to vector<1x32xf32>
    %239 = vector.broadcast %238 : vector<1x32xf32> to vector<16x32xf32>
    %240 = arith.mulf %237, %239 : vector<16x32xf32>
    %241 = arith.addf %236, %240 : vector<16x32xf32>
    %c1_168 = arith.constant 1 : index
    %c0_169 = arith.constant 0 : index
    %242 = vector.load %arg20[%c1_168, %c0_169] : memref<19x32xf32, #tpu.memory_space<vmem>>, vector<16x32xf32>
    %243 = vector.extract_strided_slice %232 {offsets = [1, 0], sizes = [1, 32], strides = [1, 1]} : vector<4x32xf32> to vector<1x32xf32>
    %244 = vector.broadcast %243 : vector<1x32xf32> to vector<16x32xf32>
    %245 = arith.mulf %242, %244 : vector<16x32xf32>
    %246 = arith.addf %241, %245 : vector<16x32xf32>
    %c2_170 = arith.constant 2 : index
    %c0_171 = arith.constant 0 : index
    %247 = vector.load %arg20[%c2_170, %c0_171] : memref<19x32xf32, #tpu.memory_space<vmem>>, vector<16x32xf32>
    %248 = vector.extract_strided_slice %232 {offsets = [2, 0], sizes = [1, 32], strides = [1, 1]} : vector<4x32xf32> to vector<1x32xf32>
    %249 = vector.broadcast %248 : vector<1x32xf32> to vector<16x32xf32>
    %250 = arith.mulf %247, %249 : vector<16x32xf32>
    %251 = arith.addf %246, %250 : vector<16x32xf32>
    %252 = arith.addf %230, %251 : vector<16x32xf32>
    %c1_172 = arith.constant 1 : index
    %c0_173 = arith.constant 0 : index
    %c0_174 = arith.constant 0 : index
    %253 = vector.load %arg12[%c1_172, %c0_173, %c0_174] : memref<3x32x32xbf16, #tpu.memory_space<vmem>>, vector<1x32x32xbf16>
    %254 = vector.shape_cast %253 : vector<1x32x32xbf16> to vector<32x32xbf16>
    %cst_175 = arith.constant dense<0.000000e+00> : vector<16x32xf32>
    %255 = tpu.matmul %252, %254, %cst_175 {dimension_numbers = #tpu.dot_dimension_numbers<[1], [0], [0], [1], [0, 0, 1, 1], [], []>} : vector<16x32xf32>, vector<32x32xbf16>, vector<16x32xf32> -> vector<16x32xf32>
    %c1_176 = arith.constant 1 : index
    %c0_177 = arith.constant 0 : index
    %c0_178 = arith.constant 0 : index
    %256 = vector.load %arg13[%c1_176, %c0_177, %c0_178] : memref<3x32x32xbf16, #tpu.memory_space<vmem>>, vector<1x32x32xbf16>
    %257 = vector.shape_cast %256 : vector<1x32x32xbf16> to vector<32x32xbf16>
    %cst_179 = arith.constant dense<0.000000e+00> : vector<16x32xf32>
    %258 = tpu.matmul %78, %257, %cst_179 {dimension_numbers = #tpu.dot_dimension_numbers<[1], [0], [0], [1], [0, 0, 1, 1], [], []>} : vector<16x32xf32>, vector<32x32xbf16>, vector<16x32xf32> -> vector<16x32xf32>
    %259 = arith.addf %255, %258 : vector<16x32xf32>
    %c1_180 = arith.constant 1 : index
    %c0_181 = arith.constant 0 : index
    %c0_182 = arith.constant 0 : index
    %260 = vector.load %arg14[%c1_180, %c0_181, %c0_182] : memref<3x1x32xf32, #tpu.memory_space<vmem>>, vector<1x1x32xf32>
    %261 = vector.shape_cast %260 : vector<1x1x32xf32> to vector<1x32xf32>
    %262 = vector.broadcast %261 : vector<1x32xf32> to vector<16x32xf32>
    %263 = arith.addf %259, %262 : vector<16x32xf32>
    %cst_183 = arith.constant 0.000000e+00 : f32
    %264 = vector.broadcast %cst_183 : f32 to vector<16x32xf32>
    %265 = arith.maximumf %263, %264 : vector<16x32xf32>
    %c1_184 = arith.constant 1 : index
    %c0_185 = arith.constant 0 : index
    %c0_186 = arith.constant 0 : index
    %266 = vector.load %arg15[%c1_184, %c0_185, %c0_186] : memref<3x32x32xbf16, #tpu.memory_space<vmem>>, vector<1x32x32xbf16>
    %267 = vector.shape_cast %266 : vector<1x32x32xbf16> to vector<32x32xbf16>
    %cst_187 = arith.constant dense<0.000000e+00> : vector<16x32xf32>
    %268 = tpu.matmul %265, %267, %cst_187 {dimension_numbers = #tpu.dot_dimension_numbers<[1], [0], [0], [1], [0, 0, 1, 1], [], []>} : vector<16x32xf32>, vector<32x32xbf16>, vector<16x32xf32> -> vector<16x32xf32>
    %c1_188 = arith.constant 1 : index
    %c0_189 = arith.constant 0 : index
    %c0_190 = arith.constant 0 : index
    %269 = vector.load %arg16[%c1_188, %c0_189, %c0_190] : memref<3x4x32xf32, #tpu.memory_space<vmem>>, vector<1x4x32xf32>
    %270 = vector.shape_cast %269 : vector<1x4x32xf32> to vector<4x32xf32>
    %c3_191 = arith.constant 3 : index
    %c0_192 = arith.constant 0 : index
    %271 = vector.load %arg20[%c3_191, %c0_192] : memref<19x32xf32, #tpu.memory_space<vmem>>, vector<16x32xf32>
    tpu.vector_store %arg20[%c3_191, %c0_192], %268 {strides = array<i32>} : memref<19x32xf32, #tpu.memory_space<vmem>>, vector<16x32xf32>,
    %272 = vector.extract_strided_slice %270 {offsets = [3, 0], sizes = [1, 32], strides = [1, 1]} : vector<4x32xf32> to vector<1x32xf32>
    %273 = vector.broadcast %272 : vector<1x32xf32> to vector<16x32xf32>
    %274 = arith.mulf %268, %273 : vector<16x32xf32>
    %c0_193 = arith.constant 0 : index
    %c0_194 = arith.constant 0 : index
    %275 = vector.load %arg20[%c0_193, %c0_194] : memref<19x32xf32, #tpu.memory_space<vmem>>, vector<16x32xf32>
    %276 = vector.extract_strided_slice %270 {offsets = [0, 0], sizes = [1, 32], strides = [1, 1]} : vector<4x32xf32> to vector<1x32xf32>
    %277 = vector.broadcast %276 : vector<1x32xf32> to vector<16x32xf32>
    %278 = arith.mulf %275, %277 : vector<16x32xf32>
    %279 = arith.addf %274, %278 : vector<16x32xf32>
    %c1_195 = arith.constant 1 : index
    %c0_196 = arith.constant 0 : index
    %280 = vector.load %arg20[%c1_195, %c0_196] : memref<19x32xf32, #tpu.memory_space<vmem>>, vector<16x32xf32>
    %281 = vector.extract_strided_slice %270 {offsets = [1, 0], sizes = [1, 32], strides = [1, 1]} : vector<4x32xf32> to vector<1x32xf32>
    %282 = vector.broadcast %281 : vector<1x32xf32> to vector<16x32xf32>
    %283 = arith.mulf %280, %282 : vector<16x32xf32>
    %284 = arith.addf %279, %283 : vector<16x32xf32>
    %c2_197 = arith.constant 2 : index
    %c0_198 = arith.constant 0 : index
    %285 = vector.load %arg20[%c2_197, %c0_198] : memref<19x32xf32, #tpu.memory_space<vmem>>, vector<16x32xf32>
    %286 = vector.extract_strided_slice %270 {offsets = [2, 0], sizes = [1, 32], strides = [1, 1]} : vector<4x32xf32> to vector<1x32xf32>
    %287 = vector.broadcast %286 : vector<1x32xf32> to vector<16x32xf32>
    %288 = arith.mulf %285, %287 : vector<16x32xf32>
    %289 = arith.addf %284, %288 : vector<16x32xf32>
    %290 = arith.addf %268, %289 : vector<16x32xf32>
    %c2_199 = arith.constant 2 : index
    %c0_200 = arith.constant 0 : index
    %c0_201 = arith.constant 0 : index
    %291 = vector.load %arg12[%c2_199, %c0_200, %c0_201] : memref<3x32x32xbf16, #tpu.memory_space<vmem>>, vector<1x32x32xbf16>
    %292 = vector.shape_cast %291 : vector<1x32x32xbf16> to vector<32x32xbf16>
    %cst_202 = arith.constant dense<0.000000e+00> : vector<16x32xf32>
    %293 = tpu.matmul %290, %292, %cst_202 {dimension_numbers = #tpu.dot_dimension_numbers<[1], [0], [0], [1], [0, 0, 1, 1], [], []>} : vector<16x32xf32>, vector<32x32xbf16>, vector<16x32xf32> -> vector<16x32xf32>
    %c2_203 = arith.constant 2 : index
    %c0_204 = arith.constant 0 : index
    %c0_205 = arith.constant 0 : index
    %294 = vector.load %arg13[%c2_203, %c0_204, %c0_205] : memref<3x32x32xbf16, #tpu.memory_space<vmem>>, vector<1x32x32xbf16>
    %295 = vector.shape_cast %294 : vector<1x32x32xbf16> to vector<32x32xbf16>
    %cst_206 = arith.constant dense<0.000000e+00> : vector<16x32xf32>
    %296 = tpu.matmul %44, %295, %cst_206 {dimension_numbers = #tpu.dot_dimension_numbers<[1], [0], [0], [1], [0, 0, 1, 1], [], []>} : vector<16x32xf32>, vector<32x32xbf16>, vector<16x32xf32> -> vector<16x32xf32>
    %297 = arith.addf %293, %296 : vector<16x32xf32>
    %c2_207 = arith.constant 2 : index
    %c0_208 = arith.constant 0 : index
    %c0_209 = arith.constant 0 : index
    %298 = vector.load %arg14[%c2_207, %c0_208, %c0_209] : memref<3x1x32xf32, #tpu.memory_space<vmem>>, vector<1x1x32xf32>
    %299 = vector.shape_cast %298 : vector<1x1x32xf32> to vector<1x32xf32>
    %300 = vector.broadcast %299 : vector<1x32xf32> to vector<16x32xf32>
    %301 = arith.addf %297, %300 : vector<16x32xf32>
    %cst_210 = arith.constant 0.000000e+00 : f32
    %302 = vector.broadcast %cst_210 : f32 to vector<16x32xf32>
    %303 = arith.maximumf %301, %302 : vector<16x32xf32>
    %c2_211 = arith.constant 2 : index
    %c0_212 = arith.constant 0 : index
    %c0_213 = arith.constant 0 : index
    %304 = vector.load %arg15[%c2_211, %c0_212, %c0_213] : memref<3x32x32xbf16, #tpu.memory_space<vmem>>, vector<1x32x32xbf16>
    %305 = vector.shape_cast %304 : vector<1x32x32xbf16> to vector<32x32xbf16>
    %cst_214 = arith.constant dense<0.000000e+00> : vector<16x32xf32>
    %306 = tpu.matmul %303, %305, %cst_214 {dimension_numbers = #tpu.dot_dimension_numbers<[1], [0], [0], [1], [0, 0, 1, 1], [], []>} : vector<16x32xf32>, vector<32x32xbf16>, vector<16x32xf32> -> vector<16x32xf32>
    %c2_215 = arith.constant 2 : index
    %c0_216 = arith.constant 0 : index
    %c0_217 = arith.constant 0 : index
    %307 = vector.load %arg16[%c2_215, %c0_216, %c0_217] : memref<3x4x32xf32, #tpu.memory_space<vmem>>, vector<1x4x32xf32>
    %308 = vector.shape_cast %307 : vector<1x4x32xf32> to vector<4x32xf32>
    %c3_218 = arith.constant 3 : index
    %c0_219 = arith.constant 0 : index
    %309 = vector.load %arg20[%c3_218, %c0_219] : memref<19x32xf32, #tpu.memory_space<vmem>>, vector<16x32xf32>
    tpu.vector_store %arg20[%c3_218, %c0_219], %306 {strides = array<i32>} : memref<19x32xf32, #tpu.memory_space<vmem>>, vector<16x32xf32>,
    %310 = vector.extract_strided_slice %308 {offsets = [3, 0], sizes = [1, 32], strides = [1, 1]} : vector<4x32xf32> to vector<1x32xf32>
    %311 = vector.broadcast %310 : vector<1x32xf32> to vector<16x32xf32>
    %312 = arith.mulf %306, %311 : vector<16x32xf32>
    %c0_220 = arith.constant 0 : index
    %c0_221 = arith.constant 0 : index
    %313 = vector.load %arg20[%c0_220, %c0_221] : memref<19x32xf32, #tpu.memory_space<vmem>>, vector<16x32xf32>
    %314 = vector.extract_strided_slice %308 {offsets = [0, 0], sizes = [1, 32], strides = [1, 1]} : vector<4x32xf32> to vector<1x32xf32>
    %315 = vector.broadcast %314 : vector<1x32xf32> to vector<16x32xf32>
    %316 = arith.mulf %313, %315 : vector<16x32xf32>
    %317 = arith.addf %312, %316 : vector<16x32xf32>
    %c1_222 = arith.constant 1 : index
    %c0_223 = arith.constant 0 : index
    %318 = vector.load %arg20[%c1_222, %c0_223] : memref<19x32xf32, #tpu.memory_space<vmem>>, vector<16x32xf32>
    %319 = vector.extract_strided_slice %308 {offsets = [1, 0], sizes = [1, 32], strides = [1, 1]} : vector<4x32xf32> to vector<1x32xf32>
    %320 = vector.broadcast %319 : vector<1x32xf32> to vector<16x32xf32>
    %321 = arith.mulf %318, %320 : vector<16x32xf32>
    %322 = arith.addf %317, %321 : vector<16x32xf32>
    %c2_224 = arith.constant 2 : index
    %c0_225 = arith.constant 0 : index
    %323 = vector.load %arg20[%c2_224, %c0_225] : memref<19x32xf32, #tpu.memory_space<vmem>>, vector<16x32xf32>
    %324 = vector.extract_strided_slice %308 {offsets = [2, 0], sizes = [1, 32], strides = [1, 1]} : vector<4x32xf32> to vector<1x32xf32>
    %325 = vector.broadcast %324 : vector<1x32xf32> to vector<16x32xf32>
    %326 = arith.mulf %323, %325 : vector<16x32xf32>
    %327 = arith.addf %322, %326 : vector<16x32xf32>
    %328 = arith.addf %306, %327 : vector<16x32xf32>
    %c0_226 = arith.constant 0 : index
    %c0_227 = arith.constant 0 : index
    %329 = vector.load %arg17[%c0_226, %c0_227] : memref<32x8xbf16, #tpu.memory_space<vmem>>, vector<32x8xbf16>
    %cst_228 = arith.constant dense<0.000000e+00> : vector<16x8xf32>
    %330 = tpu.matmul %328, %329, %cst_228 {dimension_numbers = #tpu.dot_dimension_numbers<[1], [0], [0], [1], [0, 0, 1, 1], [], []>} : vector<16x32xf32>, vector<32x8xbf16>, vector<16x8xf32> -> vector<16x8xf32>
    %c0_229 = arith.constant 0 : index
    %c0_230 = arith.constant 0 : index
    %331 = vector.load %arg18[%c0_229, %c0_230] : memref<1x8xf32, #tpu.memory_space<vmem>>, vector<1x8xf32>
    %332 = vector.broadcast %331 : vector<1x8xf32> to vector<16x8xf32>
    %333 = arith.addf %330, %332 : vector<16x8xf32>
    %334 = arith.negf %333 : vector<16x8xf32>
    %335 = math.exp %334 : vector<16x8xf32>
    %cst_231 = arith.constant 1.000000e+00 : f32
    %336 = vector.broadcast %cst_231 : f32 to vector<16x8xf32>
    %337 = arith.addf %336, %335 : vector<16x8xf32>
    %338 = arith.divf %336, %337 : vector<16x8xf32>
    %c0_232 = arith.constant 0 : index
    %c0_233 = arith.constant 0 : index
    %c0_234 = arith.constant 0 : index
    %339 = vector.load %arg19[%c0_232, %c0_233, %c0_234] : memref<1x16x8xf32, #tpu.memory_space<vmem>>, vector<1x16x8xf32>
    %340 = vector.shape_cast %339 : vector<1x16x8xf32> to vector<16x8xf32>
    %341 = vector.shape_cast %338 : vector<16x8xf32> to vector<1x16x8xf32>
    tpu.vector_store %arg19[%c0_232, %c0_233, %c0_234], %341 {strides = array<i32>} : memref<1x16x8xf32, #tpu.memory_space<vmem>>, vector<1x16x8xf32>,
    return
  }
  func.func @transform_0(%arg0: i32) -> (i32, i32, i32) {
    %c0_i32 = arith.constant 0 : i32
    %c0_i32_0 = arith.constant 0 : i32
    %c0_i32_1 = arith.constant 0 : i32
    return %arg0, %c0_i32, %c0_i32_0 : i32, i32, i32
  }
  func.func @transform_1(%arg0: i32) -> (i32, i32) {
    %c0_i32 = arith.constant 0 : i32
    %c0_i32_0 = arith.constant 0 : i32
    %c0_i32_1 = arith.constant 0 : i32
    return %c0_i32, %c0_i32_0 : i32, i32
  }
  func.func @transform_2(%arg0: i32) -> (i32, i32) {
    %c0_i32 = arith.constant 0 : i32
    %c0_i32_0 = arith.constant 0 : i32
    %c0_i32_1 = arith.constant 0 : i32
    return %c0_i32, %c0_i32_0 : i32, i32
  }
  func.func @transform_3(%arg0: i32) -> (i32, i32, i32) {
    %c0_i32 = arith.constant 0 : i32
    %c0_i32_0 = arith.constant 0 : i32
    %c0_i32_1 = arith.constant 0 : i32
    %c0_i32_2 = arith.constant 0 : i32
    return %c0_i32, %c0_i32_0, %c0_i32_1 : i32, i32, i32
  }
  func.func @transform_4(%arg0: i32) -> (i32, i32, i32) {
    %c0_i32 = arith.constant 0 : i32
    %c0_i32_0 = arith.constant 0 : i32
    %c0_i32_1 = arith.constant 0 : i32
    %c0_i32_2 = arith.constant 0 : i32
    return %c0_i32, %c0_i32_0, %c0_i32_1 : i32, i32, i32
  }
  func.func @transform_5(%arg0: i32) -> (i32, i32, i32) {
    %c0_i32 = arith.constant 0 : i32
    %c0_i32_0 = arith.constant 0 : i32
    %c0_i32_1 = arith.constant 0 : i32
    %c0_i32_2 = arith.constant 0 : i32
    return %c0_i32, %c0_i32_0, %c0_i32_1 : i32, i32, i32
  }
  func.func @transform_6(%arg0: i32) -> (i32, i32, i32) {
    %c0_i32 = arith.constant 0 : i32
    %c0_i32_0 = arith.constant 0 : i32
    %c0_i32_1 = arith.constant 0 : i32
    %c0_i32_2 = arith.constant 0 : i32
    return %c0_i32, %c0_i32_0, %c0_i32_1 : i32, i32, i32
  }
  func.func @transform_7(%arg0: i32) -> (i32, i32, i32) {
    %c0_i32 = arith.constant 0 : i32
    %c0_i32_0 = arith.constant 0 : i32
    %c0_i32_1 = arith.constant 0 : i32
    %c0_i32_2 = arith.constant 0 : i32
    return %c0_i32, %c0_i32_0, %c0_i32_1 : i32, i32, i32
  }
  func.func @transform_8(%arg0: i32) -> (i32, i32, i32) {
    %c0_i32 = arith.constant 0 : i32
    %c0_i32_0 = arith.constant 0 : i32
    %c0_i32_1 = arith.constant 0 : i32
    %c0_i32_2 = arith.constant 0 : i32
    return %c0_i32, %c0_i32_0, %c0_i32_1 : i32, i32, i32
  }
  func.func @transform_9(%arg0: i32) -> (i32, i32, i32) {
    %c0_i32 = arith.constant 0 : i32
    %c0_i32_0 = arith.constant 0 : i32
    %c0_i32_1 = arith.constant 0 : i32
    %c0_i32_2 = arith.constant 0 : i32
    return %c0_i32, %c0_i32_0, %c0_i32_1 : i32, i32, i32
  }
  func.func @transform_10(%arg0: i32) -> (i32, i32, i32) {
    %c0_i32 = arith.constant 0 : i32
    %c0_i32_0 = arith.constant 0 : i32
    %c0_i32_1 = arith.constant 0 : i32
    %c0_i32_2 = arith.constant 0 : i32
    return %c0_i32, %c0_i32_0, %c0_i32_1 : i32, i32, i32
  }
  func.func @transform_11(%arg0: i32) -> (i32, i32, i32) {
    %c0_i32 = arith.constant 0 : i32
    %c0_i32_0 = arith.constant 0 : i32
    %c0_i32_1 = arith.constant 0 : i32
    %c0_i32_2 = arith.constant 0 : i32
    return %c0_i32, %c0_i32_0, %c0_i32_1 : i32, i32, i32
  }
  func.func @transform_12(%arg0: i32) -> (i32, i32, i32) {
    %c0_i32 = arith.constant 0 : i32
    %c0_i32_0 = arith.constant 0 : i32
    %c0_i32_1 = arith.constant 0 : i32
    %c0_i32_2 = arith.constant 0 : i32
    return %c0_i32, %c0_i32_0, %c0_i32_1 : i32, i32, i32
  }
  func.func @transform_13(%arg0: i32) -> (i32, i32, i32) {
    %c0_i32 = arith.constant 0 : i32
    %c0_i32_0 = arith.constant 0 : i32
    %c0_i32_1 = arith.constant 0 : i32
    %c0_i32_2 = arith.constant 0 : i32
    return %c0_i32, %c0_i32_0, %c0_i32_1 : i32, i32, i32
  }
  func.func @transform_14(%arg0: i32) -> (i32, i32, i32) {
    %c0_i32 = arith.constant 0 : i32
    %c0_i32_0 = arith.constant 0 : i32
    %c0_i32_1 = arith.constant 0 : i32
    %c0_i32_2 = arith.constant 0 : i32
    return %c0_i32, %c0_i32_0, %c0_i32_1 : i32, i32, i32
  }
  func.func @transform_15(%arg0: i32) -> (i32, i32, i32) {
    %c0_i32 = arith.constant 0 : i32
    %c0_i32_0 = arith.constant 0 : i32
    %c0_i32_1 = arith.constant 0 : i32
    %c0_i32_2 = arith.constant 0 : i32
    return %c0_i32, %c0_i32_0, %c0_i32_1 : i32, i32, i32
  }
  func.func @transform_16(%arg0: i32) -> (i32, i32) {
    %c0_i32 = arith.constant 0 : i32
    %c0_i32_0 = arith.constant 0 : i32
    %c0_i32_1 = arith.constant 0 : i32
    return %c0_i32, %c0_i32_0 : i32, i32
  }
  func.func @transform_17(%arg0: i32) -> (i32, i32) {
    %c0_i32 = arith.constant 0 : i32
    %c0_i32_0 = arith.constant 0 : i32
    %c0_i32_1 = arith.constant 0 : i32
    return %c0_i32, %c0_i32_0 : i32, i32
  }
  func.func @transform_18(%arg0: i32) -> (i32, i32, i32) {
    %c0_i32 = arith.constant 0 : i32
    %c0_i32_0 = arith.constant 0 : i32
    %c0_i32_1 = arith.constant 0 : i32
    return %arg0, %c0_i32, %c0_i32_0 : i32, i32, i32
  }
}

</mosaic_0001>

<bundles_post_ra>
// kernel: tpu_custom_call.1
= control target key start
LH: loop header
LB: loop body
LE: loop exit
PB: predicated region body
PF: predicated region fallthrough
CT: control target
= control target key end

     0   :  { %s4455_s0 = inlined_call_operand.hbm [shape: f32[2,16,16], index: 0, kind: input, shape index: {}]   ;;  %s4456_s1 = inlined_call_operand.hbm [shape: bf16[16,32], index: 1, kind: input, shape index: {}]   ;;  %s4457_s2 = inlined_call_operand.hbm [shape: f32[1,32], index: 2, kind: input, shape index: {}]   ;;  %s4458_s3 = inlined_call_operand.hbm [shape: bf16[3,32,32], index: 3, kind: input, shape index: {}]   ;;  %s4459_s4 = inlined_call_operand.hbm [shape: f32[3,1,32], index: 4, kind: input, shape index: {}]   ;;  %s4460_s5 = inlined_call_operand.hbm [shape: bf16[3,32,32], index: 5, kind: input, shape index: {}]   ;;  %s4461_s6 = inlined_call_operand.vmem [shape: f32[3,4,32], index: 6, kind: input, shape index: {}]   ;;  %s4462_s7 = inlined_call_operand.hbm [shape: bf16[3,32,32], index: 7, kind: input, shape index: {}]   ;;  %s4463_s8 = inlined_call_operand.hbm [shape: f32[3,1,32], index: 8, kind: input, shape index: {}]   ;;  %s4464_s9 = inlined_call_operand.hbm [shape: bf16[3,32,32], index: 9, kind: input, shape index: {}]   ;;  %s4465_s10 = inlined_call_operand.vmem [shape: f32[3,4,32], index: 10, kind: input, shape index: {}]   ;;  %s4466_s11 = inlined_call_operand.hbm [shape: bf16[3,32,32], index: 11, kind: input, shape index: {}]   ;;  %s4467_s12 = inlined_call_operand.hbm [shape: bf16[3,32,32], index: 12, kind: input, shape index: {}]   ;;  %s4468_s13 = inlined_call_operand.vmem [shape: f32[3,1,32], index: 13, kind: input, shape index: {}]   ;;  %s4469_s14 = inlined_call_operand.hbm [shape: bf16[3,32,32], index: 14, kind: input, shape index: {}]   ;;  %s4470_s15 = inlined_call_operand.vmem [shape: f32[3,4,32], index: 15, kind: input, shape index: {}]   ;;  %s4471_s16 = inlined_call_operand.vmem [shape: bf16[32,8], index: 16, kind: input, shape index: {}]   ;;  %s4472_s17 = inlined_call_operand.vmem [shape: f32[1,8], index: 17, kind: input, shape index: {}]   ;;  %s4473_s18 = inlined_call_operand.vmem [shape: f32[2,16,8], index: 18, kind: output, shape index: {}]  }
   0x1   :  { %4485 = sst [smem:[#allocation29_spill]] %s4455_s0 }
   0x2   :  { %4486 = sst [smem:[#allocation30_spill]] %s4456_s1 }
   0x3   :  { %4487 = sst [smem:[#allocation31_spill]] %s4457_s2 }
   0x4   :  { %4488 = sst [smem:[#allocation32_spill]] %s4458_s3 }
   0x5   :  { %4489 = sst [smem:[#allocation33_spill]] %s4459_s4 }
   0x6   :  { %4490 = sst [smem:[#allocation34_spill]] %s4470_s15 }
   0x7   :  { %4491 = sst [smem:[#allocation35_spill]] %s4471_s16 }
   0x8   :  { %4492 = sst [smem:[#allocation36_spill]] %s4472_s17 }
   0x9   :  { %4493 = sst [smem:[#allocation37_spill]] %s4473_s18 }
   0xa   :  { %23 = vsyncpa [#allocation4], 0 }
   0xb   :  { %25 = vsyncpa [#allocation4 + $0x1], 0 }
   0xc   :  { %26 = vsyncpa [#allocation6], 0 }
   0xd   :  { %27 = vsyncpa [#allocation9], 0 }
   0xe   :  { %28 = vsyncpa [#allocation12], 0 }
   0xf   :  { %29 = vsyncpa [#allocation15], 0 }
  0x10   :  { %30 = vsyncpa [#allocation18], 0 }
  0x11   :  { %31 = vsyncpa [#allocation21], 0  ;;  %s4011_s27 = smov 0   ;;  %s4013_s28 = smov 0  }
  0x12   :  { %s4015_s29 = smov 0   ;;  %s4017_s30 = smov 0  }
  0x13 LB: > { %s3897_s0 = smov [#allocation5]   ;;  %s4032_s1 = sadd.s32 4294967295, %s3895_s30   ;;  %s3895_s30 = sphi %s4017_s30, %s4529_s30   ;;  %s3891_s29 = sphi %s4015_s29, %s4528_s29   ;;  %s3887_s28 = sphi %s4013_s28, %s4527_s28   ;;  %s3883_s27 = sphi %s4011_s27, %s4526_s27  }
  0x14   : > { %s463_s19 = sshll.u32 %s3897_s0, 4  ;;  %p2916_p0 = scmp.ge.s32.totalorder %s3895_s30, 1  ;;  %s464_s19 = int_to_ptr.vmem [resolvable:$true] %s463_s19 }
  0x15   : > { %p4478_p1 = scmp.eq.s32.totalorder %s4032_s1, 0  ;;  %p451_p2 = scmp.lt.s32.totalorder %s3895_s30, 3 }
  0x16   : > { %s3898_s21 = smov [#allocation8]   ;;  %s3899_s23 = smov [#allocation11]  }
  0x17   : > { %p4037_p3 = pnand %p2916_p0, %p451_p2  ;;  %s487_s22 = sshll.u32 %s3898_s21, 4  ;;  %s4049_s22 = int_to_ptr.vmem [resolvable:$true] %s487_s22 }
  0x18   : > { %s513_s24 = sshll.u32 %s3899_s23, 4  ;;  %s3534_s26 = scalar_lea.vmem %s464_s19, 128  ;;  %s4051_s24 = int_to_ptr.vmem [resolvable:$true] %s513_s24 }
  0x19   : > { %s4494_s20 = scalar_select %p4037_p3, 1, 0 }
  0x1a   : > { %p3359_p4 = pneg %p4037_p3  ;;  %p3535_p7 = scmp.ne.s32.totalorder %s464_s19, %s3534_s26 }
  0x1b   : > { %p3542_p10 = scmp.lt.s32.totalorder %s464_s19, %s464_s19  ;;  %p3543_p11 = scmp.lt.s32.totalorder %s3534_s26, %s3534_s26 }
  0x1c   : > { %p4045_p5 = pnand %p3359_p4, %p4478_p1 }
  0x1d   : > { %p3544_p12 = por %p3543_p11, %p3542_p10 }
  0x1e   : > { %p4055_p6 = pneg %p4045_p5 }
  0x20   : > { %p3537_p8 = pnand %p3535_p7, %p4055_p6 }
  0x22   : > { %p3538_p9 = pneg %p3537_p8 }
  0x24   : > { %p3545_p13 = pnand %p3544_p12, %p3538_p9 }
  0x26   : > { %3548 = shalt.err (!%p3545_p13)
}
  0x27   : > { %s4479_s0 = smov 64   ;;  %s4481_s21 = smov 4  }
  0x28   : > { %s4497_s17 = sld [smem:[#allocation30_spill]]  ;;  %s3560_s16 = scalar_lea.vmem %s4049_s22, 768 }
  0x29   : > { %p3561_p0 = scmp.ne.s32.totalorder %s4049_s22, %s3560_s16  ;;  %p3568_p7 = scmp.lt.s32.totalorder %s4049_s22, %s4049_s22 }
  0x2a   : > { %p3569_p8 = scmp.lt.s32.totalorder %s3560_s16, %s3560_s16 }
  0x2b   : > { %p3563_p2 = pnand %p3561_p0, %p4055_p6 }
  0x2c   : > { %p3570_p9 = por %p3569_p8, %p3568_p7 }
  0x2d   : > { %p3564_p4 = pneg %p3563_p2 }
  0x2e   : > { %3362 = dma.hbm_to_vmem [thread:$0]  (!%p4045_p5), %s4497_s17, 128, %s464_s19, [#allocation6], %s4479_s0, %s4479_s0, %s4481_s21  }
  0x2f   : > { %p3571_p10 = pnand %p3570_p9, %p3564_p4 }
  0x31   : > { %3574 = shalt.err (!%p3571_p10)
}
  0x32   : > { %s4498_s3 = sld [smem:[#allocation32_spill]]  ;;  %s3586_s17 = scalar_lea.vmem %s4051_s24, 768 }
  0x33   : > { %p3587_p11 = scmp.ne.s32.totalorder %s4051_s24, %s3586_s17  ;;  %p3594_p0 = scmp.lt.s32.totalorder %s4051_s24, %s4051_s24 }
  0x34   : > { %p3595_p2 = scmp.lt.s32.totalorder %s3586_s17, %s3586_s17 }
  0x35   : > { %p3589_p12 = pnand %p3587_p11, %p4055_p6 }
  0x36   : > { %p3596_p4 = por %p3595_p2, %p3594_p0 }
  0x37   : > { %p3590_p13 = pneg %p3589_p12 }
  0x38   : > { %3368 = dma.hbm_to_vmem [thread:$0]  (!%p4045_p5), %s4498_s3, 768, %s4049_s22, [#allocation9], %s4479_s0, %s4479_s0, %s4481_s21  }
  0x39   : > { %p3597_p7 = pnand %p3596_p4, %p3590_p13 }
  0x3b   : > { %3600 = shalt.err (!%p3597_p7)
}
  0x3c   : > { %3374 = dma.hbm_to_vmem [thread:$0]  (!%p4045_p5), %s4460_s5, 768, %s4051_s24, [#allocation12], %s4479_s0, %s4479_s0, %s4481_s21  }
  0x3d   : > { %s3902_s22 = smov [#allocation14]   ;;  %s3903_s26 = smov [#allocation17]  }
  0x3e   : > { %s542_s23 = sshll.u32 %s3902_s22, 4  ;;  %s571_s18 = sshll.u32 %s3903_s26, 4  ;;  %s543_s23 = int_to_ptr.vmem [resolvable:$true] %s542_s23  ;;  %s572_s18 = int_to_ptr.vmem [resolvable:$true] %s571_s18 }
  0x3f   : > { %s3612_s17 = scalar_lea.vmem %s543_s23, 48  ;;  %s3619_s3 = scalar_lea.vmem %s543_s23, 64 }
  0x40   : > { %p3613_p8 = scmp.ne.s32.totalorder %s543_s23, %s3612_s17  ;;  %p3620_p11 = scmp.lt.s32.totalorder %s543_s23, %s543_s23 }
  0x41   : > { %p3621_p12 = scmp.lt.s32.totalorder %s3619_s3, %s3612_s17 }
  0x42   : > { %p3615_p9 = pnand %p3613_p8, %p4055_p6 }
  0x43   : > { %p3622_p13 = por %p3621_p12, %p3620_p11 }
  0x44   : > { %p3616_p10 = pneg %p3615_p9 }
  0x46   : > { %p3623_p0 = pnand %p3622_p13, %p3616_p10 }
  0x48   : > { %3626 = shalt.err (!%p3623_p0)
}
  0x49   : > { %s4477_s15 = smov 16   ;;  %s3905_s24 = smov 1  }
  0x4a   : > { %3380 = dma.hbm_to_vmem [thread:$0]  (!%p4045_p5), %s4463_s8, 48, %s543_s23, [#allocation15], %s4477_s15, %s4477_s15, %s3905_s24  }
  0x4b   : > { %s3638_s22 = scalar_lea.vmem %s572_s18, 768  ;;  %p3646_p8 = scmp.lt.s32.totalorder %s572_s18, %s572_s18 }
  0x4c   : > { %p3639_p2 = scmp.ne.s32.totalorder %s572_s18, %s3638_s22  ;;  %p3647_p9 = scmp.lt.s32.totalorder %s3638_s22, %s3638_s22 }
  0x4e   : > { %p3641_p4 = pnand %p3639_p2, %p4055_p6  ;;  %p3648_p10 = por %p3647_p9, %p3646_p8 }
  0x50   : > { %p3642_p7 = pneg %p3641_p4 }
  0x52   : > { %p3649_p11 = pnand %p3648_p10, %p3642_p7 }
  0x54   : > { %3652 = shalt.err (!%p3649_p11)
}
  0x55   : > { %3386 = dma.hbm_to_vmem [thread:$0]  (!%p4045_p5), %s4466_s11, 768, %s572_s18, [#allocation18], %s4479_s0, %s4479_s0, %s4481_s21  }
  0x56   : > { %s3906_s23 = smov [#allocation7]   ;;  %s3907_s16 = smov [#allocation10]  }
  0x57   : > { %s477_s17 = sshll.u32 %s3906_s23, 4  ;;  %s500_s19 = sshll.u32 %s3907_s16, 4  ;;  %s478_s17 = int_to_ptr.vmem [resolvable:$true] %s477_s17  ;;  %s501_s19 = int_to_ptr.vmem [resolvable:$true] %s500_s19 }
  0x58   : > { %s3664_s15 = scalar_lea.vmem %s478_s17, 16  ;;  %s3671_s22 = scalar_lea.vmem %s478_s17, 32 }
  0x59   : > { %p3665_p12 = scmp.ne.s32.totalorder %s478_s17, %s3664_s15  ;;  %p3672_p2 = scmp.lt.s32.totalorder %s478_s17, %s478_s17 }
  0x5a   : > { %p3673_p4 = scmp.lt.s32.totalorder %s3671_s22, %s3664_s15 }
  0x5b   : > { %p3667_p13 = pnand %p3665_p12, %p4055_p6 }
  0x5c   : > { %p3674_p7 = por %p3673_p4, %p3672_p2 }
  0x5d   : > { %p3668_p0 = pneg %p3667_p13 }
  0x5f   : > { %p3675_p8 = pnand %p3674_p7, %p3668_p0 }
  0x61   : > { %3678 = shalt.err (!%p3675_p8)
}
  0x62   : > { %s4499_s26 = sld [smem:[#allocation31_spill]]  ;;  %s3690_s23 = scalar_lea.vmem %s501_s19, 48 }
  0x63   : > { %p3691_p9 = scmp.ne.s32.totalorder %s501_s19, %s3690_s23  ;;  %s3697_s16 = scalar_lea.vmem %s501_s19, 64 }
  0x64   : > { %p3698_p12 = scmp.lt.s32.totalorder %s501_s19, %s501_s19  ;;  %p3699_p13 = scmp.lt.s32.totalorder %s3697_s16, %s3690_s23 }
  0x65   : > { %p3693_p10 = pnand %p3691_p9, %p4055_p6 }
  0x66   : > { %p3700_p1 = por %p3699_p13, %p3698_p12 }
  0x67   : > { %p3694_p11 = pneg %p3693_p10 }
  0x68   : > { %3365 = dma.hbm_to_vmem [thread:$0]  (!%p4045_p5), %s4499_s26, 16, %s478_s17, [#allocation6]  }
  0x69   : > { %p3701_p2 = pnand %p3700_p1, %p3694_p11 }
  0x6b   : > { %3704 = shalt.err (!%p3701_p2)
}
  0x6c   : > { %s4500_s15 = smov 16   ;;  %s4501_s4 = sld [smem:[#allocation33_spill]] }
  0x6d   : > { %s3908_s17 = smov [#allocation13]   ;;  %s3909_s26 = smov [#allocation16]  }
  0x6e   : > { %s529_s18 = sshll.u32 %s3908_s17, 4  ;;  %s555_s0 = sshll.u32 %s3909_s26, 4  ;;  %s530_s18 = int_to_ptr.vmem [resolvable:$true] %s529_s18  ;;  %s556_s0 = int_to_ptr.vmem [resolvable:$true] %s555_s0 }
  0x6f   : > { %s3716_s21 = scalar_lea.vmem %s530_s18, 768  ;;  %p3724_p7 = scmp.lt.s32.totalorder %s530_s18, %s530_s18 }
  0x70   : > { %p3717_p0 = scmp.ne.s32.totalorder %s530_s18, %s3716_s21  ;;  %p3725_p8 = scmp.lt.s32.totalorder %s3716_s21, %s3716_s21 }
  0x72   : > { %3371 = dma.hbm_to_vmem [thread:$0]  (!%p4045_p5), %s4501_s4, 48, %s501_s19, [#allocation9], %s4500_s15, %s4500_s15, %s3905_s24  }
  0x73   : > { %p3719_p1 = pnand %p3717_p0, %p4055_p6  ;;  %p3726_p9 = por %p3725_p8, %p3724_p7 }
  0x75   : > { %p3720_p4 = pneg %p3719_p1 }
  0x77   : > { %p3727_p10 = pnand %p3726_p9, %p3720_p4 }
  0x79   : > { %3730 = shalt.err (!%p3727_p10)
}
  0x7a   : > { %s4502_s23 = smov 4   ;;  %s4503_s16 = smov 64  }
  0x7b   : > { %3377 = dma.hbm_to_vmem [thread:$0]  (!%p4045_p5), %s4462_s7, 768, %s530_s18, [#allocation12], %s4503_s16, %s4503_s16, %s4502_s23  }
  0x7c   : > { %s3742_s15 = scalar_lea.vmem %s556_s0, 768  ;;  %p3750_p2 = scmp.lt.s32.totalorder %s556_s0, %s556_s0 }
  0x7d   : > { %p3743_p11 = scmp.ne.s32.totalorder %s556_s0, %s3742_s15  ;;  %p3751_p0 = scmp.lt.s32.totalorder %s3742_s15, %s3742_s15 }
  0x7f   : > { %p3745_p12 = pnand %p3743_p11, %p4055_p6  ;;  %p3752_p1 = por %p3751_p0, %p3750_p2 }
  0x81   : > { %p3746_p13 = pneg %p3745_p12 }
  0x83   : > { %p3753_p4 = pnand %p3752_p1, %p3746_p13 }
  0x85   : > { %3756 = shalt.err (!%p3753_p4)
}
  0x86   : > { %3383 = dma.hbm_to_vmem [thread:$0]  (!%p4045_p5), %s4464_s9, 768, %s556_s0, [#allocation15], %s4503_s16, %s4503_s16, %s4502_s23  }
  0x87   : > { %s3910_s3 = smov [#allocation19]   ;;  %s3911_s18 = smov [#allocation20]  }
  0x88   : > { %s584_s17 = sshll.u32 %s3910_s3, 4  ;;  %s600_s26 = sshll.u32 %s3911_s18, 4  ;;  %s585_s17 = int_to_ptr.vmem [resolvable:$true] %s584_s17  ;;  %s601_s26 = int_to_ptr.vmem [resolvable:$true] %s600_s26 }
  0x89   : > { %s3768_s24 = scalar_lea.vmem %s585_s17, 768  ;;  %p3776_p10 = scmp.lt.s32.totalorder %s585_s17, %s585_s17 }
  0x8a   : > { %p3769_p7 = scmp.ne.s32.totalorder %s585_s17, %s3768_s24  ;;  %p3777_p11 = scmp.lt.s32.totalorder %s3768_s24, %s3768_s24 }
  0x8c   : > { %p3771_p8 = pnand %p3769_p7, %p4055_p6  ;;  %p3778_p12 = por %p3777_p11, %p3776_p10 }
  0x8e   : > { %p3772_p9 = pneg %p3771_p8 }
  0x90   : > { %p3779_p13 = pnand %p3778_p12, %p3772_p9 }
  0x92   : > { %3782 = shalt.err (!%p3779_p13)
}
  0x93   : > { %3389 = dma.hbm_to_vmem [thread:$0]  (!%p4045_p5), %s4467_s12, 768, %s585_s17, [#allocation18], %s4503_s16, %s4503_s16, %s4502_s23  }
  0x94   : > { %s3794_s15 = scalar_lea.vmem %s601_s26, 768  ;;  %p3802_p4 = scmp.lt.s32.totalorder %s601_s26, %s601_s26 }
  0x95   : > { %p3795_p2 = scmp.ne.s32.totalorder %s601_s26, %s3794_s15  ;;  %p3803_p7 = scmp.lt.s32.totalorder %s3794_s15, %s3794_s15 }
  0x97   : > { %p3797_p0 = pnand %p3795_p2, %p4055_p6  ;;  %p3804_p8 = por %p3803_p7, %p3802_p4 }
  0x99   : > { %p3798_p1 = pneg %p3797_p0 }
  0x9b   : > { %p3805_p9 = pnand %p3804_p8, %p3798_p1 }
  0x9d   : > { %3808 = shalt.err (!%p3805_p9)
}
  0x9e   : > { %3392 = dma.hbm_to_vmem [thread:$0]  (!%p4045_p5), %s4469_s14, 768, %s601_s26, [#allocation21], %s4503_s16, %s4503_s16, %s4502_s23  }
  0x9f   : > { %s4177_s2 = sadd.s32 1, %s3895_s30   ;;  %s44_s3 = sadd.s32 1, %s3891_s29 }
  0xa0   : > { %s41_s25 = ssub.s32 %s3895_s30, %s4177_s2  ;;  %p51_p10 = scmp.ne.s32.totalorder %s3891_s29, %s3887_s28 }
  0xa1   : > { %p42_p6 = scmp.eq.s32.totalorder %s41_s25, 0  ;;  %p52_p11 = scmp.eq.s32.totalorder %s3895_s30, 0 }
  0xa2   : > { %p57_p12 = scmp.ne.s32.totalorder %s3887_s28, %s3883_s27  ;;  %p4504_p2 = scmp.eq.s32.totalorder %s4032_s1, 0 }
  0xa3   : > { %s4188_s17 = scalar_select %p42_p6, %s3891_s29, %s44_s3  }
  0xa4   : > { %p53_p13 = por %p52_p11, %p51_p10  ;;  %p4192_p0 = por %p4504_p2, %p57_p12 }
  0xa5   : > { %p3408_p1 = scmp.lt.s32.totalorder %s3895_s30, 2  ;;  %s623_s24 = sand.u32 1, %s3891_s29  }
  0xa6   : > { %s4505_s18 = scalar_select %p4192_p0, 1, 0 }
  0xa7   : > { %s2929_s23 = sshll.u32 %s623_s24, 4  ;;  %s3061_s16 = sshll.u32 %s3895_s30, 8 }
  0xa8   : > { %s4506_s19 = sld [smem:[#allocation29_spill]]  ;;  %s627_s27 = scalar_lea.vmem [#allocation3], %s2929_s23 }
  0xa9   : > { %s634_s21 = sshll.u32 %s627_s27, 4  ;;  %p4206_p5 = pnand %p3408_p1, %p53_p13  ;;  %s4204_s21 = int_to_ptr.vmem [resolvable:$true] %s634_s21 }
  0xaa   : > { %s4210_s25 = scalar_lea.sflag [#allocation4], %s623_s24 }
  0xab   : > { %p3811_p7 = pneg %p4206_p5 }
  0xae   : > { %s4202_s15 = scalar_lea.hbm %s4506_s19, %s3061_s16  ;;  %s3814_s23 = scalar_lea.hbm %s4506_s19, 512 }
  0xaf   : > { %s3809_s30 = scalar_lea.hbm %s4202_s15, 256  ;;  %p3815_p6 = scmp.lt.s32.totalorder %s4202_s15, %s4506_s19 }
  0xb0   : > { %p3810_p4 = scmp.ne.s32.totalorder %s4202_s15, %s3809_s30  ;;  %p3816_p10 = scmp.lt.s32.totalorder %s3814_s23, %s3809_s30 }
  0xb2   : > { %p3812_p8 = pnand %p3811_p7, %p3810_p4  ;;  %p3817_p11 = por %p3816_p10, %p3815_p6 }
  0xb4   : > { %p3813_p9 = pneg %p3812_p8 }
  0xb6   : > { %p3818_p12 = pnand %p3817_p11, %p3813_p9 }
  0xb8   : > { %3821 = shalt.err (!%p3818_p12)
}
  0xb9   : > { %s3822_s24 = scalar_lea.vmem %s4204_s21, 256  ;;  %s3912_s27 = smov [#allocation3]  }
  0xba   : > { %p3823_p13 = scmp.ne.s32.totalorder %s4204_s21, %s3822_s24  ;;  %s3827_s4 = sshll.u32 %s3912_s27, 4  ;;  %s3828_s4 = int_to_ptr.vmem [resolvable:$false] %s3827_s4 }
  0xbb   : > { %s3829_s3 = scalar_lea.vmem %s3828_s4, 512  ;;  %p3830_p4 = scmp.lt.s32.totalorder %s4204_s21, %s3828_s4 }
  0xbc   : > { %p3825_p2 = pnand %p3823_p13, %p3811_p7  ;;  %p3831_p8 = scmp.lt.s32.totalorder %s3829_s3, %s3822_s24 }
  0xbe   : > { %p3826_p1 = pneg %p3825_p2  ;;  %p3832_p0 = por %p3831_p8, %p3830_p4 }
  0xc0   : > { %p3833_p3 = pnand %p3832_p0, %p3826_p1 }
  0xc2   : > { %3836 = shalt.err (!%p3833_p3)
}
  0xc3   : > { %s3913_s30 = smov 128   ;;  %s3914_s16 = smov 8  }
  0xc4   : > { %3396 = dma.hbm_to_vmem [thread:$0]  (!%p4206_p5), %s4202_s15, 256, %s4204_s21, %s4210_s25, %s3913_s30, %s3913_s30, %s3914_s16  }
  0xc5   : > { %p4508_p7 = scmp.ne.s32.totalorder %s4494_s20, 0 }
  0xc6   : > { %s648_s23 = sand.u32 (!%p4508_p7), 1, %s3887_s28   ;;  %p4509_p9 = scmp.ne.s32.totalorder (!%p4508_p7), %s4505_s18, 0 }
  0xc7   : > { %646 = sbr.rel (%p4508_p7) target bundleno = 4391 (0x1127), region = 92  ;;  %s2933_s26 = sshll.u32 (!%p4508_p7), %s648_s23, 4 }
  0xc8   : > { %s649_s4 = scalar_lea.sflag (!%p4508_p7), [#allocation4], %s648_s23  ;;  %s652_s0 = scalar_lea.vmem (!%p4508_p7), [#allocation3], %s2933_s26 }
  0xcc   : > { %3854 = dma.done.wait (%p4509_p9), %s649_s4, 256  }
  0xcd   : > { %3856 = vsyncadd (%p4509_p9), %s649_s4, 4294967040  ;;  %p4510_p3 = scmp.eq.s32.totalorder %s4032_s1, 0 }
  0xcf   : > { %3858 = dma.done.wait (%p4510_p3), [#allocation6], 144   ;;  %p4511_p0 = pmov %p4510_p3 }
  0xd1   : > { %3860 = vsyncadd (%p4511_p0), [#allocation6], 4294967152  ;;  %p4512_p5 = pmov %p4511_p0 }
  0xd2   : > { %p4513_p6 = pmov %p4511_p0 }
  0xd3   : > { %3862 = dma.done.wait (%p4512_p5), [#allocation9], 816  }
  0xd4   : > { %3864 = vsyncadd (%p4513_p6), [#allocation9], 4294966480  ;;  %p4514_p10 = pmov %p4511_p0 }
  0xd5   : > { %p4515_p11 = pmov %p4511_p0 }
  0xd6   : > { %3866 = dma.done.wait (%p4514_p10), [#allocation12], 1536  }
  0xd7   : > { %3868 = vsyncadd (%p4515_p11), [#allocation12], 4294965760  ;;  %p4516_p12 = pmov %p4511_p0 }
  0xd8   : > { %p4517_p13 = pmov %p4511_p0 }
  0xd9   : > { %3870 = dma.done.wait (%p4516_p12), [#allocation15], 816  }
  0xda   : > { %3872 = vsyncadd (%p4517_p13), [#allocation15], 4294966480  ;;  %p4518_p2 = pmov %p4511_p0 }
  0xdb   : > { %p4519_p1 = pmov %p4511_p0 }
  0xdc   : > { %3874 = dma.done.wait (%p4518_p2), [#allocation18], 1536  }
  0xdd   : > { %3876 = vsyncadd (%p4519_p1), [#allocation18], 4294965760  ;;  %p4520_p4 = pmov %p4511_p0 }
  0xde   : > { %p4521_p8 = pmov %p4511_p0 }
  0xdf   : > { %3878 = dma.done.wait (%p4520_p4), [#allocation21], 768  }
  0xe0   : > { %3880 = vsyncadd (%p4521_p8), [#allocation21], 4294966528  ;;  %vm774_vm0 = vcmask 130048   ;;  %v3470_v0 = vld [vmem:[#allocation5] sm:$0xff]   ;;  %v758_v2 = vld [vmem:[%s652_s0 + $0x8] sm:$0xff]  ;;  %vm854_vm1 = vcmask 261120   ;;  %v969_v24 = vlaneseq }
  0xe1   : > { %v757_v1 = vld [vmem:[%s652_s0] sm:$0xff]  ;;  %3154 = vmatprep.subr.bf16.mxu0 %v3470_v0  ;;  %v2947_v5 = vld [vmem:[#allocation7] ss:$0 sm:$0xff]  ;;  %v2951_v14 = vld [vmem:[#allocation10] ss:$0 sm:$0xff]  ;;  %vm755_vm2 = vcmask 256000  }
  0xe2   : > { %3156 = vmatprep.mubr.msk.f32.mxu0 %vm774_vm0, %v757_v1  ;;  %3155 = vmatpush3.bf16.msra.mxu0 %v3470_v0  ;;  %v3471_v3 = vld [vmem:[#allocation8 + $0x8] sm:$0xff]   ;;  %v3472_v4 = vld [vmem:[#allocation8] sm:$0xff]   ;;  %v3474_v13 = vld [vmem:[#allocation11] sm:$0xff]   ;;  %v3915_v21 = vmov 0.0   ;;  %v970_v25 = vshrl.u32 %v969_v24, 7  ;;  %s4522_s18 = sld [smem:[#allocation34_spill]] }
  0xe3   : > { %3159 = vmatprep.subr.bf16.mxu1 %v3471_v3  ;;  %v3473_v12 = vld [vmem:[#allocation11 + $0x8] sm:$0xff]   ;;  %756 = vst.msk [vmem:[#allocation2] sm:$0x7] %vm755_vm2, %v3915_v21  ;;  %v3476_v23 = vld [vmem:[#allocation8 + $0x10] sm:$0xff]   ;;  %v3478_v60 = vld [vmem:[#allocation11 + $0x10] sm:$0xff]   ;;  %s4523_s16 = sld [smem:[#allocation35_spill]] }
  0xe4   : > { %3160 = vmatpush3.bf16.msra.mxu1 %v3471_v3  ;;  %3166 = vmatprep.subr.bf16.mxu0 %v3473_v12  ;;  %v3475_v22 = vld [vmem:[#allocation8 + $0x18] sm:$0xff]   ;;  %v4267_v28 = vsub.s32 3, %v970_v25  ;;  %v4270_v29 = vsub.s32 0, %v970_v25  ;;  %v4275_v31 = vsub.s32 1, %v970_v25  ;;  %v4277_v32 = vsub.s32 2, %v970_v25  ;;  %v3477_v59 = vld [vmem:[#allocation11 + $0x18] sm:$0xff]  }
  0xe5   : > { %3157 = vmatmul.mubr.msk.f32.vlgmr.msra.gmra.mxu0 %vm774_vm0, %v758_v2  ;;  %3161 = vmatprep.subr.bf16.mxu1 %v3472_v4  ;;  %v835_v30 = vld [vmem:[%s4461_s6] sm:$0xf]  ;;  %v2961_v61 = vld [vmem:[#allocation10 + $0x1] ss:$0 sm:$0xff]  ;;  %s4524_s21 = sld [smem:[#allocation36_spill]]  ;;  %p749_p7 = scmp.lt.s32.totalorder %s4032_s1, 1 }
  0xe6   : > { %3167 = vmatpush3.bf16.msra.mxu0 %v3473_v12  ;;  %v972_v33 = vrot.slane %v835_v30, %v4267_v28  ;;  %v980_v34 = vrot.slane %v835_v30, %v4270_v29  ;;  %v990_v35 = vrot.slane %v835_v30, %v4275_v31  ;;  %v1000_v39 = vrot.slane %v835_v30, %v4277_v32  ;;  %s4525_s27 = sld [smem:[#allocation37_spill]] }
  0xe7   : > { %3168 = vmatprep.subr.bf16.mxu0 %v3474_v13  ;;  %s4531_s1 = smov (!%p749_p7, %s4032_s1), 1  ;;  %vm2740_vm3 = vcmask 64512  }
  0xe8   : > { %3162 = vmatpush3.bf16.msra.mxu1 %v3472_v4  ;;  %v3479_v4 = vld [vmem:[#allocation8 + $0x28] sm:$0xff]   ;;  %s3062_s22 = sshll.u32 %s4531_s1, 4 }
  0xe9   : > { %3173 = vmatprep.subr.bf16.mxu1 %v3475_v22 }
  0xea   : > { %3169 = vmatpush3.bf16.msra.mxu0 %v3474_v13 }
  0xeb   : > { %3180 = vmatprep.subr.bf16.mxu0 %v3477_v59 }
  0xec   : > { %s753_s3 = scalar_lea.vmem %s4525_s27, %s3062_s22 }
 0x1a5   : > { %v3158_v6 = vpop.f32.mrf.mxu0 }
 0x1a6   : > { %v821_v7 = vadd.f32 %v3158_v6, %v2947_v5 }
 0x1a7   : > { %v815_v8 = vpop.f32.mrf.mxu0 }
 0x1a8   : > { %v816_v9 = vadd.f32 %v2947_v5, %v815_v8  ;;  %v825_v11 = vmax.f32 %v821_v7, 0.0  ;;  %v3480_v5 = vld [vmem:[#allocation8 + $0x20] sm:$0xff]  }
 0x1a9   : > { %v2960_v8 = vld [vmem:[%s4461_s6 + $0x4] sm:$0xf] }
 0x1aa   : > { %v824_v10 = vmax.f32 %v816_v9, 0.0  ;;  %v1156_v9 = vrot.slane %v2960_v8, %v4267_v28 }
 0x1ac   : > { %3163 = vmatprep.mubr.msk.f32.mxu1 %vm854_vm1, %v824_v10  ;;  %v1164_v10 = vrot.slane %v2960_v8, %v4270_v29 }
 0x1ad   : > { %3164 = vmatmul.mubr.msk.f32.vlgmr.msra.gmra.mxu1 %vm854_vm1, %v825_v11  ;;  %v1174_v11 = vrot.slane %v2960_v8, %v4275_v31 }
 0x1ae   : > { %3174 = vmatpush3.bf16.msra.mxu1 %v3475_v22 }
 0x1af   : > { %3175 = vmatprep.subr.bf16.mxu1 %v3476_v23 }
 0x1b2   : > { %3176 = vmatpush3.bf16.msra.mxu1 %v3476_v23 }
 0x1b3   : > { %3187 = vmatprep.subr.bf16.mxu1 %v3479_v4 }
 0x26d   : > { %v3165_v15 = vpop.f32.mrf.mxu1 }
 0x26e   : > { %v901_v16 = vadd.f32 %v3165_v15, %v2951_v14  ;;  %v1184_v15 = vrot.slane %v2960_v8, %v4277_v32 }
 0x26f   : > { %v895_v17 = vpop.f32.mrf.mxu1 }
 0x270   : > { %v896_v18 = vadd.f32 %v2951_v14, %v895_v17  ;;  %v905_v20 = vmax.f32 %v901_v16, 0.0 }
 0x272   : > { %v904_v19 = vmax.f32 %v896_v18, 0.0 }
 0x274   : > { %3170 = vmatprep.mubr.msk.f32.mxu0 %vm854_vm1, %v904_v19 }
 0x275   : > { %3171 = vmatmul.mubr.msk.f32.vlgmr.msra.gmra.mxu0 %vm854_vm1, %v905_v20 }
 0x276   : > { %3181 = vmatpush3.bf16.msra.mxu0 %v3477_v59 }
 0x277   : > { %3182 = vmatprep.subr.bf16.mxu0 %v3478_v60 }
 0x27a   : > { %3183 = vmatpush3.bf16.msra.mxu0 %v3478_v60 }
 0x335   : > { %v3172_v26 = vpop.f32.mrf.mxu0 }
 0x336   : > { %968 = vst.msk [vmem:[#allocation2 + $0xb] sm:$0xff] %vm854_vm1, %v3172_v26  ;;  %v974_v40 = vmul.f32 %v3172_v26, %v972_v33 }
 0x337   : > { %v958_v27 = vpop.f32.mrf.mxu0 }
 0x338   : > { %967 = vst.msk [vmem:[#allocation2 + $0x3] sm:$0xff] %vm854_vm1, %v958_v27  ;;  %v973_v41 = vmul.f32 %v972_v33, %v958_v27 }
 0x33f   : > { %v975_v36 = vld [vmem:[#allocation2] sm:$0xff]  ;;  %v976_v37 = vld [vmem:[#allocation2 + $0x8] sm:$0xff] }
 0x340   : > { %v985_v38 = vld [vmem:[#allocation2 + $0x1] sm:$0xff]  ;;  %v981_v42 = vmul.f32 %v980_v34, %v975_v36  ;;  %v982_v43 = vmul.f32 %v980_v34, %v976_v37  ;;  %v986_v44 = vld [vmem:[#allocation2 + $0x9] sm:$0xff] }
 0x341   : > { %v995_v45 = vld [vmem:[#allocation2 + $0x2] sm:$0xff]  ;;  %v996_v46 = vld [vmem:[#allocation2 + $0xa] sm:$0xff]  ;;  %v991_v49 = vmul.f32 %v990_v35, %v985_v38  ;;  %v992_v50 = vmul.f32 %v990_v35, %v986_v44 }
 0x342   : > { %v983_v47 = vadd.f32 %v981_v42, %v973_v41  ;;  %v984_v48 = vadd.f32 %v982_v43, %v974_v40  ;;  %v1001_v53 = vmul.f32 %v1000_v39, %v995_v45  ;;  %v1002_v54 = vmul.f32 %v1000_v39, %v996_v46  ;;  %v3481_v39 = vld [vmem:[#allocation11 + $0x28] sm:$0xff]   ;;  %v3482_v40 = vld [vmem:[#allocation11 + $0x20] sm:$0xff]   ;;  %v2971_v41 = vld [vmem:[#allocation10 + $0x2] ss:$0 sm:$0xff] }
 0x343   : > { %3194 = vmatprep.subr.bf16.mxu0 %v3481_v39 }
 0x344   : > { %v993_v51 = vadd.f32 %v991_v49, %v983_v47  ;;  %v994_v52 = vadd.f32 %v992_v50, %v984_v48  ;;  %v3483_v48 = vld [vmem:[#allocation13 + $0x8] sm:$0xff]   ;;  %v3484_v49 = vld [vmem:[#allocation13] sm:$0xff]  }
 0x346   : > { %v1003_v55 = vadd.f32 %v1001_v53, %v993_v51  ;;  %v1004_v56 = vadd.f32 %v1002_v54, %v994_v52  ;;  %v2970_v52 = vld [vmem:[%s4461_s6 + $0x8] sm:$0xf] }
 0x347   : > { %v1340_v53 = vrot.slane %v2970_v52, %v4267_v28  ;;  %v1348_v54 = vrot.slane %v2970_v52, %v4270_v29 }
 0x348   : > { %v4283_v57 = vadd.f32 %v1003_v55, %v958_v27  ;;  %v4285_v58 = vadd.f32 %v3172_v26, %v1004_v56  ;;  %v1358_v55 = vrot.slane %v2970_v52, %v4275_v31 }
 0x34a   : > { %3177 = vmatprep.mubr.msk.f32.mxu1 %vm854_vm1, %v4283_v57 }
 0x34b   : > { %3178 = vmatmul.mubr.msk.f32.vlgmr.msra.gmra.mxu1 %vm854_vm1, %v4285_v58 }
 0x34c   : > { %3188 = vmatpush3.bf16.msra.mxu1 %v3479_v4 }
 0x34d   : > { %3189 = vmatprep.subr.bf16.mxu1 %v3480_v5 }
 0x350   : > { %3190 = vmatpush3.bf16.msra.mxu1 %v3480_v5 }
 0x351   : > { %3201 = vmatprep.subr.bf16.mxu1 %v3483_v48 }
 0x40b   : > { %v3179_v62 = vpop.f32.mrf.mxu1 }
 0x40c   : > { %v1085_v63 = vadd.f32 %v3179_v62, %v2961_v61 }
 0x40d   : > { %v1079_v0 = vpop.f32.mrf.mxu1 }
 0x40e   : > { %v1080_v1 = vadd.f32 %v2961_v61, %v1079_v0  ;;  %v1089_v3 = vmax.f32 %v1085_v63, 0.0  ;;  %v1368_v61 = vrot.slane %v2970_v52, %v4277_v32 }
 0x410   : > { %v1088_v2 = vmax.f32 %v1080_v1, 0.0 }
 0x412   : > { %3184 = vmatprep.mubr.msk.f32.mxu0 %vm854_vm1, %v1088_v2 }
 0x413   : > { %3185 = vmatmul.mubr.msk.f32.vlgmr.msra.gmra.mxu0 %vm854_vm1, %v1089_v3 }
 0x414   : > { %3195 = vmatpush3.bf16.msra.mxu0 %v3481_v39 }
 0x415   : > { %3196 = vmatprep.subr.bf16.mxu0 %v3482_v40 }
 0x418   : > { %3197 = vmatpush3.bf16.msra.mxu0 %v3482_v40 }
 0x4d3   : > { %v3186_v6 = vpop.f32.mrf.mxu0 }
 0x4d4   : > { %1152 = vst.msk [vmem:[#allocation2 + $0xb] sm:$0xff] %vm854_vm1, %v3186_v6  ;;  %v1158_v16 = vmul.f32 %v3186_v6, %v1156_v9 }
 0x4d5   : > { %v1142_v7 = vpop.f32.mrf.mxu0 }
 0x4d6   : > { %1151 = vst.msk [vmem:[#allocation2 + $0x3] sm:$0xff] %vm854_vm1, %v1142_v7  ;;  %v1157_v17 = vmul.f32 %v1156_v9, %v1142_v7 }
 0x4dd   : > { %v1159_v12 = vld [vmem:[#allocation2] sm:$0xff]  ;;  %v1160_v13 = vld [vmem:[#allocation2 + $0x8] sm:$0xff] }
 0x4de   : > { %v1169_v14 = vld [vmem:[#allocation2 + $0x1] sm:$0xff]  ;;  %v1165_v18 = vmul.f32 %v1164_v10, %v1159_v12  ;;  %v1166_v19 = vmul.f32 %v1164_v10, %v1160_v13  ;;  %v1170_v20 = vld [vmem:[#allocation2 + $0x9] sm:$0xff] }
 0x4df   : > { %v1179_v21 = vld [vmem:[#allocation2 + $0x2] sm:$0xff]  ;;  %v1180_v22 = vld [vmem:[#allocation2 + $0xa] sm:$0xff]  ;;  %v1175_v25 = vmul.f32 %v1174_v11, %v1169_v14  ;;  %v1176_v26 = vmul.f32 %v1174_v11, %v1170_v20 }
 0x4e0   : > { %v1167_v23 = vadd.f32 %v1165_v18, %v1157_v17  ;;  %v1168_v24 = vadd.f32 %v1166_v19, %v1158_v16  ;;  %v1185_v33 = vmul.f32 %v1184_v15, %v1179_v21  ;;  %v1186_v34 = vmul.f32 %v1184_v15, %v1180_v22  ;;  %v3485_v17 = vld [vmem:[#allocation16 + $0x8] sm:$0xff]   ;;  %v3486_v18 = vld [vmem:[#allocation16] sm:$0xff]   ;;  %v2980_v19 = vld [vmem:[#allocation14] ss:$0 sm:$0xff] }
 0x4e1   : > { %3208 = vmatprep.subr.bf16.mxu0 %v3485_v17 }
 0x4e2   : > { %v1177_v27 = vadd.f32 %v1175_v25, %v1167_v23  ;;  %v1178_v30 = vadd.f32 %v1176_v26, %v1168_v24  ;;  %v3487_v26 = vld [vmem:[#allocation13 + $0x18] sm:$0xff]  }
 0x4e4   : > { %v1187_v35 = vadd.f32 %v1185_v33, %v1177_v27  ;;  %v1188_v36 = vadd.f32 %v1186_v34, %v1178_v30  ;;  %v3488_v27 = vld [vmem:[#allocation13 + $0x10] sm:$0xff]   ;;  %v1384_v34 = vld [vmem:[%s4465_s10] sm:$0xf] }
 0x4e5   : > { %v1538_v39 = vrot.slane %v1384_v34, %v4275_v31 }
 0x4e6   : > { %v4302_v37 = vadd.f32 %v1187_v35, %v1142_v7  ;;  %v4304_v38 = vadd.f32 %v3186_v6, %v1188_v36  ;;  %v1520_v35 = vrot.slane %v1384_v34, %v4267_v28  ;;  %v1528_v36 = vrot.slane %v1384_v34, %v4270_v29 }
 0x4e8   : > { %3191 = vmatprep.mubr.msk.f32.mxu1 %vm854_vm1, %v4302_v37 }
 0x4e9   : > { %3192 = vmatmul.mubr.msk.f32.vlgmr.msra.gmra.mxu1 %vm854_vm1, %v4304_v38 }
 0x4ea   : > { %3202 = vmatpush3.bf16.msra.mxu1 %v3483_v48 }
 0x4eb   : > { %3203 = vmatprep.subr.bf16.mxu1 %v3484_v49 }
 0x4ee   : > { %3204 = vmatpush3.bf16.msra.mxu1 %v3484_v49 }
 0x4ef   : > { %3215 = vmatprep.subr.bf16.mxu1 %v3487_v26 }
 0x5a9   : > { %v3193_v42 = vpop.f32.mrf.mxu1 }
 0x5aa   : > { %v1269_v43 = vadd.f32 %v3193_v42, %v2971_v41 }
 0x5ab   : > { %v1263_v44 = vpop.f32.mrf.mxu1 }
 0x5ac   : > { %v1264_v45 = vadd.f32 %v2971_v41, %v1263_v44  ;;  %v1273_v47 = vmax.f32 %v1269_v43, 0.0  ;;  %v1548_v43 = vrot.slane %v1384_v34, %v4277_v32 }
 0x5ae   : > { %v1272_v46 = vmax.f32 %v1264_v45, 0.0 }
 0x5b0   : > { %3198 = vmatprep.mubr.msk.f32.mxu0 %vm854_vm1, %v1272_v46 }
 0x5b1   : > { %3199 = vmatmul.mubr.msk.f32.vlgmr.msra.gmra.mxu0 %vm854_vm1, %v1273_v47 }
 0x5b2   : > { %3209 = vmatpush3.bf16.msra.mxu0 %v3485_v17  ;;  %v2989_v17 = vld [vmem:[%s4465_s10 + $0x4] sm:$0xf] }
 0x5b3   : > { %3210 = vmatprep.subr.bf16.mxu0 %v3486_v18 }
 0x5b6   : > { %3211 = vmatpush3.bf16.msra.mxu0 %v3486_v18  ;;  %v1704_v18 = vrot.slane %v2989_v17, %v4267_v28 }
 0x671   : > { %v3200_v50 = vpop.f32.mrf.mxu0 }
 0x672   : > { %1336 = vst.msk [vmem:[#allocation2 + $0xb] sm:$0xff] %vm854_vm1, %v3200_v50  ;;  %v1342_v62 = vmul.f32 %v3200_v50, %v1340_v53 }
 0x673   : > { %v1326_v51 = vpop.f32.mrf.mxu0 }
 0x674   : > { %1335 = vst.msk [vmem:[#allocation2 + $0x3] sm:$0xff] %vm854_vm1, %v1326_v51  ;;  %v1341_v63 = vmul.f32 %v1340_v53, %v1326_v51 }
 0x67b   : > { %v1343_v56 = vld [vmem:[#allocation2] sm:$0xff]  ;;  %v1344_v59 = vld [vmem:[#allocation2 + $0x8] sm:$0xff] }
 0x67c   : > { %v1353_v60 = vld [vmem:[#allocation2 + $0x1] sm:$0xff]  ;;  %v1349_v0 = vmul.f32 %v1348_v54, %v1343_v56  ;;  %v1350_v1 = vmul.f32 %v1348_v54, %v1344_v59  ;;  %v1354_v2 = vld [vmem:[#allocation2 + $0x9] sm:$0xff] }
 0x67d   : > { %v1363_v3 = vld [vmem:[#allocation2 + $0x2] sm:$0xff]  ;;  %v1364_v4 = vld [vmem:[#allocation2 + $0xa] sm:$0xff]  ;;  %v1359_v7 = vmul.f32 %v1358_v55, %v1353_v60  ;;  %v1360_v8 = vmul.f32 %v1358_v55, %v1354_v2 }
 0x67e   : > { %v1351_v5 = vadd.f32 %v1349_v0, %v1341_v63  ;;  %v1352_v6 = vadd.f32 %v1350_v1, %v1342_v62  ;;  %v1369_v11 = vmul.f32 %v1368_v61, %v1363_v3  ;;  %v1370_v12 = vmul.f32 %v1368_v61, %v1364_v4  ;;  %v3489_v1 = vld [vmem:[#allocation16 + $0x18] sm:$0xff]   ;;  %v3490_v2 = vld [vmem:[#allocation16 + $0x10] sm:$0xff]  }
 0x67f   : > { %3222 = vmatprep.subr.bf16.mxu0 %v3489_v1  ;;  %v2990_v3 = vld [vmem:[#allocation14 + $0x1] ss:$0 sm:$0xff] }
 0x680   : > { %v1361_v9 = vadd.f32 %v1359_v7, %v1351_v5  ;;  %v1362_v10 = vadd.f32 %v1360_v8, %v1352_v6 }
 0x682   : > { %v1371_v13 = vadd.f32 %v1369_v11, %v1361_v9  ;;  %v1372_v14 = vadd.f32 %v1370_v12, %v1362_v10  ;;  %v3491_v10 = vld [vmem:[#allocation13 + $0x28] sm:$0xff]   ;;  %v3492_v11 = vld [vmem:[#allocation13 + $0x20] sm:$0xff]  }
 0x683   : > { %v3493_v12 = vld [vmem:[#allocation19 + $0x8] sm:$0xff]  }
 0x684   : > { %v4321_v15 = vadd.f32 %v1371_v13, %v1326_v51  ;;  %v4323_v16 = vadd.f32 %v3200_v50, %v1372_v14 }
 0x686   : > { %3205 = vmatprep.mubr.msk.f32.mxu1 %vm854_vm1, %v4321_v15 }
 0x687   : > { %3206 = vmatmul.mubr.msk.f32.vlgmr.msra.gmra.mxu1 %vm854_vm1, %v4323_v16 }
 0x688   : > { %3216 = vmatpush3.bf16.msra.mxu1 %v3487_v26 }
 0x689   : > { %3217 = vmatprep.subr.bf16.mxu1 %v3488_v27 }
 0x68c   : > { %3218 = vmatpush3.bf16.msra.mxu1 %v3488_v27 }
 0x68d   : > { %3229 = vmatprep.subr.bf16.mxu1 %v3491_v10 }
 0x747   : > { %v3207_v20 = vpop.f32.mrf.mxu1 }
 0x748   : > { %v1449_v21 = vadd.f32 %v3207_v20, %v2980_v19  ;;  %v1722_v20 = vrot.slane %v2989_v17, %v4275_v31 }
 0x749   : > { %v1443_v22 = vpop.f32.mrf.mxu1 }
 0x74a   : > { %v1444_v23 = vadd.f32 %v2980_v19, %v1443_v22  ;;  %v1453_v25 = vmax.f32 %v1449_v21, 0.0  ;;  %v1712_v19 = vrot.slane %v2989_v17, %v4270_v29 }
 0x74c   : > { %v1452_v24 = vmax.f32 %v1444_v23, 0.0 }
 0x74e   : > { %3212 = vmatprep.mubr.msk.f32.mxu0 %vm854_vm1, %v1452_v24  ;;  %v1732_v24 = vrot.slane %v2989_v17, %v4277_v32 }
 0x74f   : > { %3213 = vmatmul.mubr.msk.f32.vlgmr.msra.gmra.mxu0 %vm854_vm1, %v1453_v25 }
 0x750   : > { %3223 = vmatpush3.bf16.msra.mxu0 %v3489_v1  ;;  %v2999_v1 = vld [vmem:[%s4465_s10 + $0x8] sm:$0xf] }
 0x751   : > { %3224 = vmatprep.subr.bf16.mxu0 %v3490_v2 }
 0x754   : > { %3225 = vmatpush3.bf16.msra.mxu0 %v3490_v2  ;;  %v1888_v2 = vrot.slane %v2999_v1, %v4267_v28 }
 0x80f   : > { %v3214_v30 = vpop.f32.mrf.mxu0 }
 0x810   : > { %1516 = vst.msk [vmem:[#allocation2 + $0xb] sm:$0xff] %vm854_vm1, %v3214_v30  ;;  %v1522_v44 = vmul.f32 %v3214_v30, %v1520_v35 }
 0x811   : > { %v1506_v33 = vpop.f32.mrf.mxu0 }
 0x812   : > { %1515 = vst.msk [vmem:[#allocation2 + $0x3] sm:$0xff] %vm854_vm1, %v1506_v33  ;;  %v1521_v45 = vmul.f32 %v1520_v35, %v1506_v33 }
 0x819   : > { %v1523_v40 = vld [vmem:[#allocation2] sm:$0xff]  ;;  %v1524_v41 = vld [vmem:[#allocation2 + $0x8] sm:$0xff] }
 0x81a   : > { %v1533_v42 = vld [vmem:[#allocation2 + $0x1] sm:$0xff]  ;;  %v1529_v46 = vmul.f32 %v1528_v36, %v1523_v40  ;;  %v1530_v47 = vmul.f32 %v1528_v36, %v1524_v41  ;;  %v1534_v48 = vld [vmem:[#allocation2 + $0x9] sm:$0xff] }
 0x81b   : > { %v1543_v49 = vld [vmem:[#allocation2 + $0x2] sm:$0xff]  ;;  %v1544_v50 = vld [vmem:[#allocation2 + $0xa] sm:$0xff]  ;;  %v1539_v53 = vmul.f32 %v1538_v39, %v1533_v42  ;;  %v1540_v54 = vmul.f32 %v1538_v39, %v1534_v48 }
 0x81c   : > { %v1531_v51 = vadd.f32 %v1529_v46, %v1521_v45  ;;  %v1532_v52 = vadd.f32 %v1530_v47, %v1522_v44  ;;  %v1549_v59 = vmul.f32 %v1548_v43, %v1543_v49  ;;  %v1550_v60 = vmul.f32 %v1548_v43, %v1544_v50  ;;  %v3494_v50 = vld [vmem:[#allocation19] sm:$0xff]  }
 0x81e   : > { %v1541_v55 = vadd.f32 %v1539_v53, %v1531_v51  ;;  %v1542_v56 = vadd.f32 %v1540_v54, %v1532_v52  ;;  %v3495_v51 = vld [vmem:[#allocation16 + $0x28] sm:$0xff]   ;;  %v3496_v52 = vld [vmem:[#allocation16 + $0x20] sm:$0xff]   ;;  %v3000_v53 = vld [vmem:[#allocation14 + $0x2] ss:$0 sm:$0xff] }
 0x81f   : > { %3236 = vmatprep.subr.bf16.mxu0 %v3495_v51 }
 0x820   : > { %v1551_v61 = vadd.f32 %v1549_v59, %v1541_v55  ;;  %v1552_v62 = vadd.f32 %v1550_v60, %v1542_v56 }
 0x822   : > { %v1553_v63 = vadd.f32 %v1551_v61, %v1506_v33  ;;  %v1554_v0 = vadd.f32 %v3214_v30, %v1552_v62  ;;  %v3499_v62 = vld [vmem:[#allocation19 + $0x18] sm:$0xff]  }
 0x824   : > { %3219 = vmatprep.mubr.msk.f32.mxu1 %vm854_vm1, %v1553_v63 }
 0x825   : > { %3220 = vmatmul.mubr.msk.f32.vlgmr.msra.gmra.mxu1 %vm854_vm1, %v1554_v0 }
 0x826   : > { %3230 = vmatpush3.bf16.msra.mxu1 %v3491_v10 }
 0x827   : > { %3231 = vmatprep.subr.bf16.mxu1 %v3492_v11 }
 0x82a   : > { %3232 = vmatpush3.bf16.msra.mxu1 %v3492_v11 }
 0x82b   : > { %3243 = vmatprep.subr.bf16.mxu1 %v3493_v12 }
 0x8e5   : > { %v3221_v4 = vpop.f32.mrf.mxu1 }
 0x8e6   : > { %v1633_v5 = vadd.f32 %v3221_v4, %v2990_v3  ;;  %v1906_v4 = vrot.slane %v2999_v1, %v4275_v31 }
 0x8e7   : > { %v1627_v6 = vpop.f32.mrf.mxu1 }
 0x8e8   : > { %v1628_v7 = vadd.f32 %v2990_v3, %v1627_v6  ;;  %v1637_v9 = vmax.f32 %v1633_v5, 0.0  ;;  %v1896_v3 = vrot.slane %v2999_v1, %v4270_v29 }
 0x8ea   : > { %v1636_v8 = vmax.f32 %v1628_v7, 0.0 }
 0x8ec   : > { %3226 = vmatprep.mubr.msk.f32.mxu0 %vm854_vm1, %v1636_v8  ;;  %v1916_v8 = vrot.slane %v2999_v1, %v4277_v32 }
 0x8ed   : > { %3227 = vmatmul.mubr.msk.f32.vlgmr.msra.gmra.mxu0 %vm854_vm1, %v1637_v9 }
 0x8ee   : > { %3237 = vmatpush3.bf16.msra.mxu0 %v3495_v51 }
 0x8ef   : > { %3238 = vmatprep.subr.bf16.mxu0 %v3496_v52 }
 0x8f2   : > { %3239 = vmatpush3.bf16.msra.mxu0 %v3496_v52 }
 0x9ad   : > { %v3228_v13 = vpop.f32.mrf.mxu0 }
 0x9ae   : > { %1700 = vst.msk [vmem:[#allocation2 + $0xb] sm:$0xff] %vm854_vm1, %v3228_v13  ;;  %v1706_v25 = vmul.f32 %v3228_v13, %v1704_v18 }
 0x9af   : > { %v1690_v14 = vpop.f32.mrf.mxu0 }
 0x9b0   : > { %1699 = vst.msk [vmem:[#allocation2 + $0x3] sm:$0xff] %vm854_vm1, %v1690_v14  ;;  %v1705_v26 = vmul.f32 %v1704_v18, %v1690_v14 }
 0x9b7   : > { %v1707_v21 = vld [vmem:[#allocation2] sm:$0xff]  ;;  %v1708_v22 = vld [vmem:[#allocation2 + $0x8] sm:$0xff] }
 0x9b8   : > { %v1717_v23 = vld [vmem:[#allocation2 + $0x1] sm:$0xff]  ;;  %v1713_v27 = vmul.f32 %v1712_v19, %v1707_v21  ;;  %v1714_v30 = vmul.f32 %v1712_v19, %v1708_v22  ;;  %v1718_v33 = vld [vmem:[#allocation2 + $0x9] sm:$0xff] }
 0x9b9   : > { %v1727_v34 = vld [vmem:[#allocation2 + $0x2] sm:$0xff]  ;;  %v1728_v35 = vld [vmem:[#allocation2 + $0xa] sm:$0xff]  ;;  %v1723_v40 = vmul.f32 %v1722_v20, %v1717_v23  ;;  %v1724_v41 = vmul.f32 %v1722_v20, %v1718_v33 }
 0x9ba   : > { %v1715_v36 = vadd.f32 %v1713_v27, %v1705_v26  ;;  %v1716_v39 = vadd.f32 %v1714_v30, %v1706_v25  ;;  %v1733_v44 = vmul.f32 %v1732_v24, %v1727_v34  ;;  %v1734_v45 = vmul.f32 %v1732_v24, %v1728_v35  ;;  %v3500_v34 = vld [vmem:[#allocation19 + $0x10] sm:$0xff]   ;;  %v3501_v35 = vld [vmem:[#allocation20 + $0x8] sm:$0xff]  }
 0x9bc   : > { %v1725_v42 = vadd.f32 %v1723_v40, %v1715_v36  ;;  %v1726_v43 = vadd.f32 %v1724_v41, %v1716_v39  ;;  %v3502_v36 = vld [vmem:[#allocation20] sm:$0xff]  }
 0x9be   : > { %v1735_v46 = vadd.f32 %v1733_v44, %v1725_v42  ;;  %v1736_v47 = vadd.f32 %v1734_v45, %v1726_v43  ;;  %v3017_v42 = vld [vmem:[%s4468_s13] ss:$0 sm:$0xff] }
 0x9c0   : > { %v1737_v48 = vadd.f32 %v1735_v46, %v1690_v14  ;;  %v1738_v49 = vadd.f32 %v3228_v13, %v1736_v47 }
 0x9c2   : > { %3233 = vmatprep.mubr.msk.f32.mxu1 %vm854_vm1, %v1737_v48  ;;  %v3503_v48 = vld [vmem:[#allocation17 + $0x18] sm:$0xff]  }
 0x9c3   : > { %3234 = vmatmul.mubr.msk.f32.vlgmr.msra.gmra.mxu1 %vm854_vm1, %v1738_v49  ;;  %v3504_v49 = vld [vmem:[#allocation17 + $0x10] sm:$0xff]  }
 0x9c4   : > { %3244 = vmatpush3.bf16.msra.mxu1 %v3493_v12  ;;  %3247 = vmatprep.mubr.msk.f32.mxu1 %vm854_vm1, %v4321_v15  ;;  %v3497_v15 = vld [vmem:[#allocation17 + $0x8] sm:$0xff]  }
 0x9c5   : > { %3245 = vmatprep.subr.bf16.mxu1 %v3494_v50  ;;  %3250 = vmatprep.subr.bf16.mxu0 %v3497_v15 }
 0x9c8   : > { %3246 = vmatpush3.bf16.msra.mxu1 %v3494_v50  ;;  %v3505_v50 = vld [vmem:[#allocation19 + $0x28] sm:$0xff]  }
 0x9c9   : > { %3257 = vmatprep.subr.bf16.mxu1 %v3501_v35 }
 0x9cb   : > { %3248 = vmatmul.mubr.msk.f32.vlgmr.msra.gmra.mxu1 %vm854_vm1, %v4323_v16  ;;  %v3498_v16 = vld [vmem:[#allocation17] sm:$0xff]  }
 0x9cc   : > { %3258 = vmatpush3.bf16.msra.mxu1 %v3501_v35  ;;  %v3510_v35 = vld [vmem:[#allocation17 + $0x20] sm:$0xff]  }
 0x9cd   : > { %3259 = vmatprep.subr.bf16.mxu1 %v3502_v36 }
 0x9d0   : > { %3260 = vmatpush3.bf16.msra.mxu1 %v3502_v36 }
 0x9d1   : > { %3271 = vmatprep.subr.bf16.mxu1 %v3503_v48 }
 0xa83   : > { %v3235_v54 = vpop.f32.mrf.mxu1 }
 0xa84   : > { %v1817_v55 = vadd.f32 %v3235_v54, %v3000_v53 }
 0xa85   : > { %v1811_v56 = vpop.f32.mrf.mxu1 }
 0xa86   : > { %v1812_v59 = vadd.f32 %v3000_v53, %v1811_v56  ;;  %v1821_v61 = vmax.f32 %v1817_v55, 0.0  ;;  %v2123_v53 = vld [vmem:[%s4522_s18] sm:$0xf] }
 0xa87   : > { %v2129_v54 = vrot.slane %v2123_v53, %v4267_v28  ;;  %v2137_v55 = vrot.slane %v2123_v53, %v4270_v29  ;;  %v2147_v56 = vrot.slane %v2123_v53, %v4275_v31 }
 0xa88   : > { %v1820_v60 = vmax.f32 %v1812_v59, 0.0 }
 0xa8a   : > { %3240 = vmatprep.mubr.msk.f32.mxu0 %vm854_vm1, %v1820_v60 }
 0xa8b   : > { %3241 = vmatmul.mubr.msk.f32.vlgmr.msra.gmra.mxu0 %vm854_vm1, %v1821_v61  ;;  %v3249_v39 = vpop.f32.mrf.mxu1 }
 0xa8c   : > { %3251 = vmatpush3.bf16.msra.mxu0 %v3497_v15  ;;  %v2157_v15 = vrot.slane %v2123_v53, %v4277_v32 }
 0xa8d   : > { %3252 = vmatprep.subr.bf16.mxu0 %v3498_v16  ;;  %v1977_v43 = vpop.f32.mrf.mxu1 }
 0xa90   : > { %3253 = vmatpush3.bf16.msra.mxu0 %v3498_v16 }
 0xa91   : > { %3264 = vmatprep.subr.bf16.mxu0 %v3499_v62 }
 0xb4b   : > { %v3242_v63 = vpop.f32.mrf.mxu0 }
 0xb4c   : > { %1884 = vst.msk [vmem:[#allocation2 + $0xb] sm:$0xff] %vm854_vm1, %v3242_v63  ;;  %v1890_v9 = vmul.f32 %v3242_v63, %v1888_v2 }
 0xb4d   : > { %v1874_v0 = vpop.f32.mrf.mxu0 }
 0xb4e   : > { %1883 = vst.msk [vmem:[#allocation2 + $0x3] sm:$0xff] %vm854_vm1, %v1874_v0  ;;  %v1889_v10 = vmul.f32 %v1888_v2, %v1874_v0 }
 0xb55   : > { %v1891_v5 = vld [vmem:[#allocation2] sm:$0xff]  ;;  %v1892_v6 = vld [vmem:[#allocation2 + $0x8] sm:$0xff] }
 0xb56   : > { %v1901_v7 = vld [vmem:[#allocation2 + $0x1] sm:$0xff]  ;;  %v1897_v11 = vmul.f32 %v1896_v3, %v1891_v5  ;;  %v1898_v12 = vmul.f32 %v1896_v3, %v1892_v6  ;;  %v1902_v13 = vld [vmem:[#allocation2 + $0x9] sm:$0xff] }
 0xb57   : > { %v1911_v14 = vld [vmem:[#allocation2 + $0x2] sm:$0xff]  ;;  %v1912_v17 = vld [vmem:[#allocation2 + $0xa] sm:$0xff]  ;;  %v1907_v20 = vmul.f32 %v1906_v4, %v1901_v7  ;;  %v1908_v21 = vmul.f32 %v1906_v4, %v1902_v13 }
 0xb58   : > { %v1899_v18 = vadd.f32 %v1897_v11, %v1889_v10  ;;  %v1900_v19 = vadd.f32 %v1898_v12, %v1890_v9  ;;  %v1917_v24 = vmul.f32 %v1916_v8, %v1911_v14  ;;  %v1918_v25 = vmul.f32 %v1916_v8, %v1912_v17 }
 0xb5a   : > { %v1909_v22 = vadd.f32 %v1907_v20, %v1899_v18  ;;  %v1910_v23 = vadd.f32 %v1908_v21, %v1900_v19  ;;  %v3506_v18 = vld [vmem:[#allocation19 + $0x20] sm:$0xff]   ;;  %v3507_v19 = vld [vmem:[#allocation20 + $0x18] sm:$0xff]  }
 0xb5b   : > { %v3508_v20 = vld [vmem:[#allocation20 + $0x10] sm:$0xff]  }
 0xb5c   : > { %v1919_v26 = vadd.f32 %v1917_v24, %v1909_v22  ;;  %v1920_v27 = vadd.f32 %v1918_v25, %v1910_v23  ;;  %v3031_v24 = vld [vmem:[%s4468_s13 + $0x1] ss:$0 sm:$0xff] }
 0xb5e   : > { %v1921_v30 = vadd.f32 %v1919_v26, %v1874_v0  ;;  %v1922_v33 = vadd.f32 %v3242_v63, %v1920_v27 }
 0xb60   : > { %3254 = vmatprep.mubr.msk.f32.mxu0 %vm854_vm1, %v1921_v30 }
 0xb61   : > { %3255 = vmatmul.mubr.msk.f32.vlgmr.msra.gmra.mxu0 %vm854_vm1, %v1922_v33 }
 0xb62   : > { %3265 = vmatpush3.bf16.msra.mxu0 %v3499_v62  ;;  %3268 = vmatprep.mubr.msk.f32.mxu0 %vm854_vm1, %v4302_v37 }
 0xb63   : > { %3266 = vmatprep.subr.bf16.mxu0 %v3500_v34 }
 0xb66   : > { %3267 = vmatpush3.bf16.msra.mxu0 %v3500_v34  ;;  %v3509_v34 = vld [vmem:[#allocation17 + $0x28] sm:$0xff]  }
 0xb67   : > { %3278 = vmatprep.subr.bf16.mxu0 %v3507_v19 }
 0xb69   : > { %3269 = vmatmul.mubr.msk.f32.vlgmr.msra.gmra.mxu0 %vm854_vm1, %v4304_v38 }
 0xb6a   : > { %3279 = vmatpush3.bf16.msra.mxu0 %v3507_v19 }
 0xb6b   : > { %3280 = vmatprep.subr.bf16.mxu0 %v3508_v20 }
 0xb6e   : > { %3281 = vmatpush3.bf16.msra.mxu0 %v3508_v20  ;;  %v3051_v20 = vld [vmem:[%s4522_s18 + $0x8] sm:$0xf] }
 0xb6f   : > { %3292 = vmatprep.subr.bf16.mxu0 %v3509_v34 }
 0xc21   : > { %v3256_v40 = vpop.f32.mrf.mxu0 }
 0xc22   : > { %v2044_v41 = vadd.f32 %v3256_v40, %v3249_v39  ;;  %v3036_v40 = vld [vmem:[%s4522_s18 + $0x4] sm:$0xf] }
 0xc23   : > { %v2038_v37 = vpop.f32.mrf.mxu0 }
 0xc24   : > { %v2039_v44 = vadd.f32 %v2038_v37, %v1977_v43  ;;  %v2055_v45 = vadd.f32 %v3017_v42, %v2044_v41  ;;  %v2375_v41 = vrot.slane %v3036_v40, %v4267_v28  ;;  %v2393_v43 = vrot.slane %v3036_v40, %v4275_v31 }
 0xc26   : > { %v2054_v46 = vadd.f32 %v3017_v42, %v2039_v44  ;;  %v2057_v38 = vmax.f32 %v2055_v45, 0.0  ;;  %v2383_v42 = vrot.slane %v3036_v40, %v4270_v29 }
 0xc28   : > { %v2056_v47 = vmax.f32 %v2054_v46, 0.0  ;;  %v2403_v46 = vrot.slane %v3036_v40, %v4277_v32 }
 0xc29   : > { %v3270_v21 = vpop.f32.mrf.mxu0 }
 0xc2a   : > { %3261 = vmatprep.mubr.msk.f32.mxu1 %vm854_vm1, %v2056_v47 }
 0xc2b   : > { %3262 = vmatmul.mubr.msk.f32.vlgmr.msra.gmra.mxu1 %vm854_vm1, %v2057_v38  ;;  %v2220_v25 = vpop.f32.mrf.mxu0 }
 0xc2c   : > { %3272 = vmatpush3.bf16.msra.mxu1 %v3503_v48 }
 0xc2d   : > { %3273 = vmatprep.subr.bf16.mxu1 %v3504_v49 }
 0xc30   : > { %3274 = vmatpush3.bf16.msra.mxu1 %v3504_v49 }
 0xc31   : > { %3285 = vmatprep.subr.bf16.mxu1 %v3505_v50 }
 0xceb   : > { %v3263_v51 = vpop.f32.mrf.mxu1 }
 0xcec   : > { %2125 = vst.msk [vmem:[#allocation2 + $0xb] sm:$0xff] %vm854_vm1, %v3263_v51  ;;  %v2131_v16 = vmul.f32 %v3263_v51, %v2129_v54 }
 0xced   : > { %v2114_v52 = vpop.f32.mrf.mxu1 }
 0xcee   : > { %2124 = vst.msk [vmem:[#allocation2 + $0x3] sm:$0xff] %vm854_vm1, %v2114_v52  ;;  %v2130_v62 = vmul.f32 %v2129_v54, %v2114_v52 }
 0xcf5   : > { %v2132_v59 = vld [vmem:[#allocation2] sm:$0xff]  ;;  %v2133_v60 = vld [vmem:[#allocation2 + $0x8] sm:$0xff] }
 0xcf6   : > { %v2142_v61 = vld [vmem:[#allocation2 + $0x1] sm:$0xff]  ;;  %v2138_v63 = vmul.f32 %v2137_v55, %v2132_v59  ;;  %v2139_v0 = vmul.f32 %v2137_v55, %v2133_v60  ;;  %v2143_v1 = vld [vmem:[#allocation2 + $0x9] sm:$0xff] }
 0xcf7   : > { %v2152_v2 = vld [vmem:[#allocation2 + $0x2] sm:$0xff]  ;;  %v2153_v3 = vld [vmem:[#allocation2 + $0xa] sm:$0xff]  ;;  %v2148_v6 = vmul.f32 %v2147_v56, %v2142_v61  ;;  %v2149_v7 = vmul.f32 %v2147_v56, %v2143_v1  ;;  %v3511_v1 = vld [vmem:[#allocation20 + $0x28] sm:$0xff]  }
 0xcf8   : > { %v2140_v4 = vadd.f32 %v2138_v63, %v2130_v62  ;;  %v2141_v5 = vadd.f32 %v2139_v0, %v2131_v16  ;;  %v2158_v10 = vmul.f32 %v2157_v15, %v2152_v2  ;;  %v2159_v11 = vmul.f32 %v2157_v15, %v2153_v3  ;;  %v3512_v2 = vld [vmem:[#allocation20 + $0x20] sm:$0xff]  }
 0xcfa   : > { %v2150_v8 = vadd.f32 %v2148_v6, %v2140_v4  ;;  %v2151_v9 = vadd.f32 %v2149_v7, %v2141_v5  ;;  %v3046_v6 = vld [vmem:[%s4468_s13 + $0x2] ss:$0 sm:$0xff] }
 0xcfc   : > { %v2160_v12 = vadd.f32 %v2158_v10, %v2150_v8  ;;  %v2161_v13 = vadd.f32 %v2159_v11, %v2151_v9 }
 0xcfe   : > { %v2162_v14 = vadd.f32 %v2160_v12, %v2114_v52  ;;  %v2163_v17 = vadd.f32 %v3263_v51, %v2161_v13 }
 0xd00   : > { %3275 = vmatprep.mubr.msk.f32.mxu1 %vm854_vm1, %v2162_v14  ;;  %v3513_v14 = vld [vmem:[%s4523_s16 + $0x8] sm:$0xff]  }
 0xd01   : > { %3276 = vmatmul.mubr.msk.f32.vlgmr.msra.gmra.mxu1 %vm854_vm1, %v2163_v17  ;;  %v3514_v17 = vld [vmem:[%s4523_s16] sm:$0xff]  }
 0xd02   : > { %3286 = vmatpush3.bf16.msra.mxu1 %v3505_v50  ;;  %3289 = vmatprep.mubr.msk.f32.mxu1 %vm854_vm1, %v4283_v57 }
 0xd03   : > { %3287 = vmatprep.subr.bf16.mxu1 %v3506_v18 }
 0xd06   : > { %3288 = vmatpush3.bf16.msra.mxu1 %v3506_v18 }
 0xd07   : > { %3299 = vmatprep.subr.bf16.mxu1 %v3511_v1 }
 0xd09   : > { %3290 = vmatmul.mubr.msk.f32.vlgmr.msra.gmra.mxu1 %vm854_vm1, %v4285_v58 }
 0xd0a   : > { %3300 = vmatpush3.bf16.msra.mxu1 %v3511_v1 }
 0xd0b   : > { %3301 = vmatprep.subr.bf16.mxu1 %v3512_v2 }
 0xd0e   : > { %3302 = vmatpush3.bf16.msra.mxu1 %v3512_v2 }
 0xdc1   : > { %v3277_v22 = vpop.f32.mrf.mxu1 }
 0xdc2   : > { %v2287_v23 = vadd.f32 %v3277_v22, %v3270_v21  ;;  %v2621_v21 = vrot.slane %v3051_v20, %v4267_v28  ;;  %v2629_v22 = vrot.slane %v3051_v20, %v4270_v29 }
 0xdc3   : > { %v2281_v57 = vpop.f32.mrf.mxu1 }
 0xdc4   : > { %v2282_v26 = vadd.f32 %v2281_v57, %v2220_v25  ;;  %v2299_v27 = vadd.f32 %v3031_v24, %v2287_v23  ;;  %v2639_v23 = vrot.slane %v3051_v20, %v4275_v31 }
 0xdc6   : > { %v2298_v30 = vadd.f32 %v3031_v24, %v2282_v26  ;;  %v2301_v58 = vmax.f32 %v2299_v27, 0.0  ;;  %v2649_v26 = vrot.slane %v3051_v20, %v4277_v32 }
 0xdc8   : > { %v2300_v33 = vmax.f32 %v2298_v30, 0.0 }
 0xdc9   : > { %v3291_v3 = vpop.f32.mrf.mxu1 }
 0xdca   : > { %3282 = vmatprep.mubr.msk.f32.mxu0 %vm854_vm1, %v2300_v33 }
 0xdcb   : > { %3283 = vmatmul.mubr.msk.f32.vlgmr.msra.gmra.mxu0 %vm854_vm1, %v2301_v58  ;;  %v2466_v7 = vpop.f32.mrf.mxu1 }
 0xdcc   : > { %3293 = vmatpush3.bf16.msra.mxu0 %v3509_v34 }
 0xdcd   : > { %3294 = vmatprep.subr.bf16.mxu0 %v3510_v35 }
 0xdd0   : > { %3295 = vmatpush3.bf16.msra.mxu0 %v3510_v35 }
 0xdd1   : > { %3306 = vmatprep.subr.bf16.mxu0 %v3513_v14 }
 0xe8b   : > { %v3284_v36 = vpop.f32.mrf.mxu0 }
 0xe8c   : > { %2371 = vst.msk [vmem:[#allocation2 + $0xb] sm:$0xff] %vm854_vm1, %v3284_v36  ;;  %v2377_v47 = vmul.f32 %v3284_v36, %v2375_v41 }
 0xe8d   : > { %v2359_v39 = vpop.f32.mrf.mxu0 }
 0xe8e   : > { %2370 = vst.msk [vmem:[#allocation2 + $0x3] sm:$0xff] %vm854_vm1, %v2359_v39  ;;  %v2376_v38 = vmul.f32 %v2375_v41, %v2359_v39 }
 0xe95   : > { %v2378_v37 = vld [vmem:[#allocation2] sm:$0xff]  ;;  %v2379_v44 = vld [vmem:[#allocation2 + $0x8] sm:$0xff] }
 0xe96   : > { %v2388_v45 = vld [vmem:[#allocation2 + $0x1] sm:$0xff]  ;;  %v2384_v48 = vmul.f32 %v2383_v42, %v2378_v37  ;;  %v2385_v49 = vmul.f32 %v2383_v42, %v2379_v44  ;;  %v2389_v50 = vld [vmem:[#allocation2 + $0x9] sm:$0xff] }
 0xe97   : > { %v2398_v51 = vld [vmem:[#allocation2 + $0x2] sm:$0xff]  ;;  %v2399_v52 = vld [vmem:[#allocation2 + $0xa] sm:$0xff]  ;;  %v2394_v55 = vmul.f32 %v2393_v43, %v2388_v45  ;;  %v2395_v56 = vmul.f32 %v2393_v43, %v2389_v50 }
 0xe98   : > { %v2386_v53 = vadd.f32 %v2384_v48, %v2376_v38  ;;  %v2387_v54 = vadd.f32 %v2385_v49, %v2377_v47  ;;  %v2404_v61 = vmul.f32 %v2403_v46, %v2398_v51  ;;  %v2405_v15 = vmul.f32 %v2403_v46, %v2399_v52  ;;  %v3052_v46 = vld [vmem:[%s4524_s21] ss:$0 sm:$0xff] }
 0xe9a   : > { %v2396_v59 = vadd.f32 %v2394_v55, %v2386_v53  ;;  %v2397_v60 = vadd.f32 %v2395_v56, %v2387_v54 }
 0xe9c   : > { %v2406_v16 = vadd.f32 %v2404_v61, %v2396_v59  ;;  %v2407_v62 = vadd.f32 %v2405_v15, %v2397_v60 }
 0xe9e   : > { %v2408_v63 = vadd.f32 %v2406_v16, %v2359_v39  ;;  %v2409_v0 = vadd.f32 %v3284_v36, %v2407_v62 }
 0xea0   : > { %3296 = vmatprep.mubr.msk.f32.mxu0 %vm854_vm1, %v2408_v63 }
 0xea1   : > { %3297 = vmatmul.mubr.msk.f32.vlgmr.msra.gmra.mxu0 %vm854_vm1, %v2409_v0 }
 0xea2   : > { %3307 = vmatpush3.bf16.msra.mxu0 %v3513_v14 }
 0xea3   : > { %3308 = vmatprep.subr.bf16.mxu0 %v3514_v17 }
 0xea6   : > { %3309 = vmatpush3.bf16.msra.mxu0 %v3514_v17 }
 0xf61   : > { %v3298_v4 = vpop.f32.mrf.mxu0 }
 0xf62   : > { %v2533_v5 = vadd.f32 %v3298_v4, %v3291_v3 }
 0xf63   : > { %v2527_v8 = vpop.f32.mrf.mxu0 }
 0xf64   : > { %v2528_v9 = vadd.f32 %v2527_v8, %v2466_v7  ;;  %v2545_v10 = vadd.f32 %v3046_v6, %v2533_v5 }
 0xf66   : > { %v2544_v11 = vadd.f32 %v3046_v6, %v2528_v9  ;;  %v2547_v13 = vmax.f32 %v2545_v10, 0.0 }
 0xf68   : > { %v2546_v12 = vmax.f32 %v2544_v11, 0.0 }
 0xf6a   : > { %3303 = vmatprep.mubr.msk.f32.mxu1 %vm854_vm1, %v2546_v12 }
 0xf6b   : > { %3304 = vmatmul.mubr.msk.f32.vlgmr.msra.gmra.mxu1 %vm854_vm1, %v2547_v13 }
0x102b   : > { %v3305_v18 = vpop.f32.mrf.mxu1 }
0x102c   : > { %2617 = vst.msk [vmem:[#allocation2 + $0xb] sm:$0xff] %vm854_vm1, %v3305_v18  ;;  %v2623_v27 = vmul.f32 %v3305_v18, %v2621_v21 }
0x102d   : > { %v2605_v19 = vpop.f32.mrf.mxu1 }
0x102e   : > { %2616 = vst.msk [vmem:[#allocation2 + $0x3] sm:$0xff] %vm854_vm1, %v2605_v19  ;;  %v2622_v30 = vmul.f32 %v2621_v21, %v2605_v19 }
0x1035   : > { %v2624_v24 = vld [vmem:[#allocation2] sm:$0xff]  ;;  %v2625_v25 = vld [vmem:[#allocation2 + $0x8] sm:$0xff] }
0x1036   : > { %v2634_v57 = vld [vmem:[#allocation2 + $0x1] sm:$0xff]  ;;  %v2630_v33 = vmul.f32 %v2629_v22, %v2624_v24  ;;  %v2631_v58 = vmul.f32 %v2629_v22, %v2625_v25  ;;  %v2635_v34 = vld [vmem:[#allocation2 + $0x9] sm:$0xff] }
0x1037   : > { %v2644_v35 = vld [vmem:[#allocation2 + $0x2] sm:$0xff]  ;;  %v2645_v36 = vld [vmem:[#allocation2 + $0xa] sm:$0xff]  ;;  %v2640_v41 = vmul.f32 %v2639_v23, %v2634_v57  ;;  %v2641_v28 = vmul.f32 %v2639_v23, %v2635_v34 }
0x1038   : > { %v2632_v39 = vadd.f32 %v2630_v33, %v2622_v30  ;;  %v2633_v40 = vadd.f32 %v2631_v58, %v2623_v27  ;;  %v2650_v43 = vmul.f32 %v2649_v26, %v2644_v35  ;;  %v2651_v31 = vmul.f32 %v2649_v26, %v2645_v36 }
0x103a   : > { %v2642_v42 = vadd.f32 %v2640_v41, %v2632_v39  ;;  %v2643_v29 = vadd.f32 %v2641_v28, %v2633_v40 }
0x103c   : > { %v2652_v37 = vadd.f32 %v2650_v43, %v2642_v42  ;;  %v2653_v44 = vadd.f32 %v2651_v31, %v2643_v29 }
0x103e   : > { %v2654_v45 = vadd.f32 %v2652_v37, %v2605_v19  ;;  %v2655_v32 = vadd.f32 %v3305_v18, %v2653_v44 }
0x1040   : > { %3310 = vmatprep.mubr.msk.f32.mxu0 %vm854_vm1, %v2654_v45 }
0x1041   : > { %3311 = vmatmul.mubr.msk.f32.vlgmr.msra.gmra.mxu0 %vm854_vm1, %v2655_v32 }
0x1101   : > { %v3312_v47 = vpop.f32.mrf.mxu0 }
0x1102   : > { %v2725_v38 = vadd.f32 %v3312_v47, %v3052_v46 }
0x1103   : > { %v2719_v48 = vpop.f32.mrf.mxu0 }
0x1104   : > { %v3058_v49 = vmul.f32 -1.442695, %v2725_v38  ;;  %v2720_v50 = vadd.f32 %v3052_v46, %v2719_v48 }
0x1106   : > { %3515 = vpow2.f32 %v3058_v49  ;;  %v3057_v51 = vmul.f32 -1.442695, %v2720_v50 }
0x1108   : > { %3517 = vpow2.f32 %v3057_v51 }
0x1113   : > { %v3516_v52 = vpop.eup %3515 }
0x1114   : > { %v2735_v53 = vadd.f32 1.0, %v3516_v52 }
0x1115   : > { %v3518_v54 = vpop.eup %3517 }
0x1116   : > { %3519 = vrcp.f32 %v2735_v53  ;;  %v2734_v55 = vadd.f32 1.0, %v3518_v54 }
0x1118   : > { %3521 = vrcp.f32 %v2734_v55 }
0x1123   : > { %v3520_v56 = vpop.eup %3519 }
0x1124   : > { %2742 = vst.msk [vmem:[%s753_s3 + $0x8] sm:$0xff] %vm2740_vm3, %v3520_v56 }
0x1125   : > { %v3522_v59 = vpop.eup %3521 }
0x1126   : > { %2741 = vst.msk [vmem:[%s753_s3] sm:$0xff] %vm2740_vm3, %v3522_v59 }
0x1127 PF: > { %p34_p9 = scmp.ge.s32.totalorder %s4177_s2, 4   ;;  %s4526_s27 = smov %s3887_s28 }
0x1128   : > { %s4527_s28 = smov %s3891_s29  ;;  %s4528_s29 = smov %s4188_s17 }
0x1129   : > { %s4529_s30 = smov %s4177_s2  ;;  %36 = sbr.rel (!%p34_p9) target bundleno = 19 (0x13), region = 202 }
0x112e   :  { %2764 = vsyncpa [#allocation4], 1 }
0x112f   :  { %2766 = vsyncpa [#allocation4 + $0x1], 1 }
0x1130   :  { %2767 = vsyncpa [#allocation6], 1 }
0x1131   :  { %2768 = vsyncpa [#allocation9], 1 }
0x1132   :  { %2769 = vsyncpa [#allocation12], 1 }
0x1133   :  { %2770 = vsyncpa [#allocation15], 1 }
0x1134   :  { %2771 = vsyncpa [#allocation18], 1 }
0x1135   :  { %2772 = vsyncpa [#allocation21], 1 }

</bundles_post_ra>
